<compile_context>
chip_gen: v7x
topology: tpu7x:2x2x1
jax: 0.10.0
libtpu: 0.0.40
codegen_flags: <defaults>
</compile_context>

<pallas_src>
import functools

import jax
import jax.numpy as jnp
from jax.experimental import pallas as pl
from jax.experimental.pallas import tpu as pltpu


def _round_up(x, m):
    return (x + m - 1) // m * m


# -----------------------------------------------------------------------------
# Generation-aware compiler knobs (safe fallbacks if the query fails).
# -----------------------------------------------------------------------------
def _device_kind():
    try:
        return jax.devices()[0].device_kind.lower()
    except Exception:
        return ""


def _is_v7x():
    k = _device_kind()
    return ("v7" in k) or ("tpu7" in k)


def _vmem_limit_bytes():
    # v7x: 64 MiB physical VMEM per core -> leave headroom for resident weights
    # plus double-buffered row tiles; v4/v5e/v6e: 128 MiB physical.
    return (48 if _is_v7x() else 64) * 1024 * 1024


def _row_axis_semantics():
    # Only core-parallel semantics actually shard the grid across v7x's 2 TCs;
    # plain "parallel" is kept on single-TC generations.
    if _is_v7x():
        return getattr(pltpu, "CORE_PARALLEL", "parallel")
    return "parallel"


# -----------------------------------------------------------------------------
# Kernel 1: fused char-CNN (all kernel sizes via one im2col / block-Toeplitz
# MXU matmul) + max-pool (tree) + bias + tanh + direct assembly of the
# [TN, E_pad] bf16 concat slab, plus per-tile BatchNorm partial sums
# (sum, sumsq) per sequence position via a one-hot matmul.
#
#   acc[n, seg_off + p*H + h] = sum_{k,e} W_i[k,e,h] * x[n, p+k, e]
#   char[n, i*H + h]          = tanh( b_i[h] + max_p acc[n, seg_off + p*H + h] )
#   slab[n, :]                = [ word[n] | char[n] | zeros(E_pad - E) ]   (bf16)
#   stats[s, :]  += onehot[s, n] * slab[n, :]        (and slab^2)          (f32)
# -----------------------------------------------------------------------------
def _char_concat_kernel(posT_ref, xc_ref, we_ref, w_ref, b_ref, o_ref, st_ref,
                        *, segs, e_pad, s_stat):
    # posT_ref: [S_stat, TN] f32 (row -> seq-position one-hot, transposed;
    #                             zero columns for padded rows)
    # xc_ref : [TN, C*Ce] bf16    we_ref: [TN, WE] bf16
    # w_ref  : [C*Ce, COLS] bf16  (block-Toeplitz conv weight, resident)
    # b_ref  : [1, sum_H] f32     (per-channel conv bias, added after pooling)
    # o_ref  : [TN, E_pad] bf16   st_ref: [2*S_stat, E_pad] f32
    acc = jnp.dot(xc_ref[...], w_ref[...],
                  preferred_element_type=jnp.float32)           # one big MXU matmul

    we = we_ref.shape[-1]
    o_ref[:, :we] = we_ref[...].astype(o_ref.dtype)             # word columns

    col = we       # output column offset
    aoff = 0       # column offset into acc
    boff = 0       # column offset into the concatenated per-channel bias
    for (P, H) in segs:                                         # static tiny loop
        vals = [acc[:, aoff + p * H: aoff + (p + 1) * H] for p in range(P)]
        while len(vals) > 1:                                    # balanced max tree
            nxt = [jnp.maximum(a, b) for a, b in zip(vals[0::2], vals[1::2])]
            if len(vals) % 2:
                nxt.append(vals[-1])
            vals = nxt
        # bias + tanh AFTER the max (both commute with max; tanh is monotonic)
        pooled = jnp.tanh(vals[0] + b_ref[:, boff:boff + H])
        o_ref[:, col:col + H] = pooled.astype(o_ref.dtype)
        col += H
        aoff += P * H
        boff += H

    if e_pad > col:                                             # keep padded lanes zero
        o_ref[:, col:] = jnp.zeros((o_ref.shape[0], e_pad - col), o_ref.dtype)

    # BatchNorm partial sums over sequence positions (f32 accumulation on MXU).
    hf = o_ref[...].astype(jnp.float32)
    ph = posT_ref[...]
    st_ref[:s_stat, :] = jnp.dot(ph, hf, preferred_element_type=jnp.float32)
    st_ref[s_stat:, :] = jnp.dot(ph, hf * hf, preferred_element_type=jnp.float32)


# -----------------------------------------------------------------------------
# Kernel 2: per-row BatchNorm affine (scale/shift precomputed from batch
# statistics) followed by the multi-layer Highway network on [TN, E_pad] tiles.
# Gate and transform matmuls are fused into one [E_pad, 2*E_pad] bf16 matmul
# per layer; 128-aligned slices feed sigmoid / relu.
# TODO(synk): the Highway class is not defined in the source file; the standard
#             gated highway is assumed: h <- sigmoid(Wt h + bt) * relu(Wh h + bh)
#             + (1 - sigmoid(.)) * h, written as h + t*(g - h).
# -----------------------------------------------------------------------------
def _bn_highway_kernel(x_ref, sc_ref, sh_ref, w_ref, b_ref, o_ref, *, n_layers):
    # x_ref : [TN, E_pad] bf16    sc_ref/sh_ref: [TN, 1] f32 (BN scale/shift)
    # w_ref : [L, E_pad, 2*E_pad] bf16 (resident)   b_ref: [L, 1, 2*E_pad] f32
    e_pad = x_ref.shape[-1]
    h = x_ref[...].astype(jnp.float32) * sc_ref[...] + sh_ref[...]   # BN affine (f32)
    for l in range(n_layers):                                        # static unrolled
        hb = h.astype(jnp.bfloat16)                                  # bf16 MXU, f32 acc
        z = jnp.dot(hb, w_ref[l], preferred_element_type=jnp.float32) + b_ref[l]
        t = jax.nn.sigmoid(z[:, :e_pad])                             # gate
        g = jax.nn.relu(z[:, e_pad:])                                # transform
        h = h + t * (g - h)                                          # == t*g + (1-t)*h
    o_ref[...] = h


# -----------------------------------------------------------------------------
# Full forward (glue in JAX, compute in Pallas).
# -----------------------------------------------------------------------------
@functools.partial(jax.jit,
                   static_argnames=("segs", "e_total", "e_pad", "row_tile"))
def word_char_embedding_forward(word_idx, char_idx, params, *,
                                segs, e_total, e_pad, row_tile):
    B, S = word_idx.shape
    C = char_idx.shape[-1]
    N = B * S
    n_pad = _round_up(max(N, 1), row_tile)
    n_tiles = n_pad // row_tile
    s_stat = _round_up(S, 8)

    # ---- embedding lookups (gathers) — plain JAX glue ----
    word_embed = jnp.take(params["word_table"], word_idx.reshape(N),
                          axis=0).astype(jnp.bfloat16)                           # [N, WE]
    char_embed = jnp.take(params["char_table"], char_idx.reshape(N, C), axis=0)  # [N, C, Ce]
    xc = char_embed.reshape(N, -1).astype(jnp.bfloat16)                          # [N, C*Ce]

    if n_pad > N:
        word_embed = jnp.pad(word_embed, ((0, n_pad - N), (0, 0)))
        xc = jnp.pad(xc, ((0, n_pad - N), (0, 0)))

    # Row -> sequence-position one-hot (transposed), zeroed for padded rows,
    # so kernel-1 BN partials neither count pad rows nor pad columns (zeros).
    rows = jnp.arange(n_pad)
    pos1h = jax.nn.one_hot(rows % S, s_stat, dtype=jnp.float32)
    pos1h = pos1h * (rows < N).astype(jnp.float32)[:, None]
    posT = pos1h.T                                                                # [S_stat, n_pad]

    WE = word_embed.shape[-1]
    K_dim = xc.shape[-1]
    COLS = params["w_toe"].shape[-1]
    CH = params["b_cat"].shape[-1]
    grid = (n_tiles,)
    cparams = pltpu.CompilerParams(
        dimension_semantics=(_row_axis_semantics(),),
        vmem_limit_bytes=_vmem_limit_bytes())

    # ---- Kernel 1: fused char CNN + concat slab (bf16) + BN partial sums ----
    concat, stats = pl.pallas_call(
        functools.partial(_char_concat_kernel, segs=segs, e_pad=e_pad,
                          s_stat=s_stat),
        out_shape=(jax.ShapeDtypeStruct((n_pad, e_pad), jnp.bfloat16),
                   jax.ShapeDtypeStruct((n_tiles * 2 * s_stat, e_pad), jnp.float32)),
        grid=grid,
        in_specs=[
            pl.BlockSpec((s_stat, row_tile), lambda i: (0, i)),
            pl.BlockSpec((row_tile, K_dim), lambda i: (i, 0)),
            pl.BlockSpec((row_tile, WE), lambda i: (i, 0)),
            pl.BlockSpec((K_dim, COLS), lambda i: (0, 0)),   # resident Toeplitz weight
            pl.BlockSpec((1, CH), lambda i: (0, 0)),         # resident per-channel bias
        ],
        out_specs=(pl.BlockSpec((row_tile, e_pad), lambda i: (i, 0)),
                   pl.BlockSpec((2 * s_stat, e_pad), lambda i: (i, 0))),
        compiler_params=cparams,
    )(posT, xc, word_embed, params["w_toe"], params["b_cat"])

    # ---- BatchNorm1d(max_seq) finalize from in-kernel partial sums (tiny, f32) ----
    # TODO(synk): training-mode batch stats only (no running mean/var eval path),
    #             matching the module fresh out of __init__.
    st = stats.reshape(n_tiles, 2, s_stat, e_pad)
    tot = jnp.sum(st, axis=(0, 3))                                     # [2, S_stat]
    cnt = jnp.float32(B * e_total)                                     # elems per channel s
    mean = tot[0, :S] / cnt                                            # [S]
    var = jnp.maximum(tot[1, :S] / cnt - mean * mean, 0.0)             # biased
    scale_s = params["bn_gamma"] * jax.lax.rsqrt(var + 1e-5)           # [S]
    shift_s = params["bn_beta"] - mean * scale_s
    scale_r = jnp.tile(scale_s, B)                    # row r = b*S + s -> scale_s[s]
    shift_r = jnp.tile(shift_s, B)
    if n_pad > N:
        scale_r = jnp.pad(scale_r, (0, n_pad - N), constant_values=1.0)
        shift_r = jnp.pad(shift_r, (0, n_pad - N))
    scale_r = scale_r.reshape(n_pad, 1)
    shift_r = shift_r.reshape(n_pad, 1)

    # ---- Kernel 2: BN affine + fused-gate Highway on row tiles ----
    L = params["hw_w"].shape[0]
    out = pl.pallas_call(
        functools.partial(_bn_highway_kernel, n_layers=L),
        out_shape=jax.ShapeDtypeStruct((n_pad, e_pad), jnp.float32),
        grid=grid,
        in_specs=[
            pl.BlockSpec((row_tile, e_pad), lambda i: (i, 0)),
            pl.BlockSpec((row_tile, 1), lambda i: (i, 0)),
            pl.BlockSpec((row_tile, 1), lambda i: (i, 0)),
            pl.BlockSpec((L, e_pad, 2 * e_pad), lambda i: (0, 0, 0)),  # resident fused W
            pl.BlockSpec((L, 1, 2 * e_pad), lambda i: (0, 0, 0)),      # resident fused b
        ],
        out_specs=pl.BlockSpec((row_tile, e_pad), lambda i: (i, 0)),
        compiler_params=cparams,
    )(concat, scale_r, shift_r, params["hw_w"], params["hw_b"])

    # positional_encoding=False by default, so no positional vector is added.
    return out[:N, :e_total].reshape(B, S, e_total)


# -----------------------------------------------------------------------------
# Host-side parameter preparation: block-Toeplitz conv weight (im2col), the
# per-channel conv bias (added after pooling), and the fused / 128-padded
# highway weight stack (zero rows keep padded columns inert).
# -----------------------------------------------------------------------------
def prepare_params(raw, *, max_chars, char_embed):
    C, Ce = max_chars, char_embed
    k_dim = C * Ce
    cols, biases, segs = [], [], []
    for w, b in zip(raw["conv_w"], raw["conv_b"]):
        ks, _, H = w.shape
        P = C - ks + 1
        wt = jnp.zeros((k_dim, P * H), jnp.float32)
        wr = w.reshape(ks * Ce, H)
        for p in range(P):
            wt = wt.at[p * Ce:(p + ks) * Ce, p * H:(p + 1) * H].set(wr)
        cols.append(wt)
        biases.append(b.reshape(1, H))
        segs.append((P, H))
    # TODO(synk): for much larger max_chars/n_channel the P-fold Toeplitz
    #             expansion should be streamed or replaced by per-tap accumulation.
    w_toe = jnp.concatenate(cols, axis=1).astype(jnp.bfloat16)
    b_cat = jnp.concatenate(biases, axis=1)          # [1, sum_H], added AFTER max-pool

    we = raw["word_table"].shape[1]
    e_total = we + sum(h for _, h in segs)
    e_pad = _round_up(e_total, 128)

    L, E, _ = raw["hw_wt"].shape

    def pad_w(w):   # [L, E, E] -> [L, E_pad, E_pad]; zero rows keep pad cols inert
        return jnp.pad(w, ((0, 0), (0, e_pad - E), (0, e_pad - E)))

    def pad_b(b):   # [L, 1, E] -> [L, 1, E_pad]
        return jnp.pad(b, ((0, 0), (0, 0), (0, e_pad - E)))

    # Fuse gate (Wt) and transform (Wh) into a single matmul per layer.
    hw_w = jnp.concatenate([pad_w(raw["hw_wt"]), pad_w(raw["hw_wh"])],
                           axis=-1).astype(jnp.bfloat16)               # [L, E_pad, 2*E_pad]
    hw_b = jnp.concatenate([pad_b(raw["hw_bt"]), pad_b(raw["hw_bh"])], axis=-1)

    params = {
        "word_table": raw["word_table"],
        "char_table": raw["char_table"],
        "w_toe": w_toe, "b_cat": b_cat,
        "hw_w": hw_w, "hw_b": hw_b,
        "bn_gamma": raw["bn_gamma"], "bn_beta": raw["bn_beta"],
    }
    return params, tuple(segs), e_total, e_pad


# -----------------------------------------------------------------------------
# Deterministic synthetic parameters + example run.
# -----------------------------------------------------------------------------
def make_params(key, *, word_vocab, word_embed, char_vocab, char_embed,
                n_channel, kernel_sizes, max_seq, highway_layers):
    embed_size = word_embed + n_channel * len(kernel_sizes)
    keys = jax.random.split(key, 4 + len(kernel_sizes))

    word_table = 0.1 * jax.random.normal(keys[0], (word_vocab, word_embed), jnp.float32)
    char_table = 0.1 * jax.random.normal(keys[1], (char_vocab, char_embed), jnp.float32)

    # Conv2d(1, n_channel, [ks, char_embed]) weights stored as [ks, Ce, H]
    # (transpose of PyTorch's [H, 1, ks, Ce]; synthetic deterministic init).
    conv_w, conv_b = [], []
    for i, ks in enumerate(kernel_sizes):
        conv_w.append(0.1 * jax.random.normal(
            keys[2 + i], (ks, char_embed, n_channel), jnp.float32))
        conv_b.append(0.01 * jnp.arange(n_channel, dtype=jnp.float32).reshape(1, n_channel))

    k0 = 2 + len(kernel_sizes)
    # BatchNorm1d(max_seq) affine params, PyTorch default init.
    bn_gamma = jnp.ones((max_seq,), jnp.float32)
    bn_beta = jnp.zeros((max_seq,), jnp.float32)

    # Highway: gate (Wt, bt) and transform (Wh, bh), stacked over layers.
    hw_wt = 0.05 * jax.random.normal(keys[k0], (highway_layers, embed_size, embed_size), jnp.float32)
    hw_bt = -1.0 * jnp.ones((highway_layers, 1, embed_size), jnp.float32)
    hw_wh = 0.05 * jax.random.normal(keys[k0 + 1], (highway_layers, embed_size, embed_size), jnp.float32)
    hw_bh = jnp.zeros((highway_layers, 1, embed_size), jnp.float32)

    return {
        "word_table": word_table, "char_table": char_table,
        "conv_w": conv_w, "conv_b": conv_b,
        "bn_gamma": bn_gamma, "bn_beta": bn_beta,
        "hw_wt": hw_wt, "hw_bt": hw_bt, "hw_wh": hw_wh, "hw_bh": hw_bh,
    }


def pick_row_tile(n_rows):
    # Large tiles amortize the ~0.35 us/step pipeline overhead; multiple of 16
    # (bf16 sublane packing) and of 128 when the grid has more than one tile.
    if n_rows >= 1024:
        return 1024
    return _round_up(max(n_rows, 1), 16)


if __name__ == "__main__":
    # Small configuration consistent with the module's forward.
    B, S = 2, 8               # batch, sequence length (== max_seq for BatchNorm1d)
    C = 12                    # max chars per word
    WORD_VOCAB, WE = 50, 32
    CHAR_VOCAB, CE = 30, 16
    N_CHANNEL = 8
    KERNEL_SIZES = (2, 3)
    HIGHWAY_LAYERS = 3

    key = jax.random.PRNGKey(0)
    kp, kw, kc = jax.random.split(key, 3)

    raw = make_params(
        kp, word_vocab=WORD_VOCAB, word_embed=WE, char_vocab=CHAR_VOCAB,
        char_embed=CE, n_channel=N_CHANNEL, kernel_sizes=KERNEL_SIZES,
        max_seq=S, highway_layers=HIGHWAY_LAYERS)
    params, segs, e_total, e_pad = prepare_params(raw, max_chars=C, char_embed=CE)

    word_idx = jax.random.randint(kw, (B, S), 0, WORD_VOCAB, dtype=jnp.int32)
    char_idx = jax.random.randint(kc, (B, S, C), 0, CHAR_VOCAB, dtype=jnp.int32)

    row_tile = pick_row_tile(B * S)

    out = word_char_embedding_forward(
        word_idx, char_idx, params,
        segs=segs, e_total=e_total, e_pad=e_pad, row_tile=row_tile)
    out = jax.block_until_ready(out)

    expected_embed = WE + N_CHANNEL * len(KERNEL_SIZES)
    assert out.shape == (B, S, expected_embed), out.shape
    assert out.dtype == jnp.float32
    assert bool(jnp.all(jnp.isfinite(out)))

    print("KERNEL_OK")
</pallas_src>

<mosaic_0001>
module attributes {stable_mosaic.version = 11 : i64} {
  func.func @_char_concat_kernel(%arg0: i32, %arg1: memref<8x16xf32, #tpu.memory_space<vmem>>, %arg2: memref<16x192xbf16, #tpu.memory_space<vmem>>, %arg3: memref<16x32xbf16, #tpu.memory_space<vmem>>, %arg4: memref<192x168xbf16, #tpu.memory_space<vmem>>, %arg5: memref<1x16xf32, #tpu.memory_space<vmem>>, %arg6: memref<16x128xbf16, #tpu.memory_space<vmem>>, %arg7: memref<16x128xf32, #tpu.memory_space<vmem>>) attributes {dimension_semantics = [#tpu.dimension_semantics<parallel>], iteration_bounds = array<i64: 1>, scalar_prefetch = 0 : i64, scratch_operands = 0 : i64, tpu.core_type = #tpu.core_type<tc>, window_params = [{transform_indices = @transform_0, window_bounds = array<i64: 8, 16>}, {transform_indices = @transform_1, window_bounds = array<i64: 16, 192>}, {transform_indices = @transform_2, window_bounds = array<i64: 16, 32>}, {pipeline_mode = #tpu.pipeline_mode<synchronous>, transform_indices = @transform_3, window_bounds = array<i64: 192, 168>}, {pipeline_mode = #tpu.pipeline_mode<synchronous>, transform_indices = @transform_4, window_bounds = array<i64: 1, 16>}, {transform_indices = @transform_5, window_bounds = array<i64: 16, 128>}, {transform_indices = @transform_6, window_bounds = array<i64: 16, 128>}]} {
    %c0 = arith.constant 0 : index
    %c0_0 = arith.constant 0 : index
    %0 = vector.load %arg2[%c0, %c0_0] : memref<16x192xbf16, #tpu.memory_space<vmem>>, vector<16x192xbf16>
    %c0_1 = arith.constant 0 : index
    %c0_2 = arith.constant 0 : index
    %1 = vector.load %arg4[%c0_1, %c0_2] : memref<192x168xbf16, #tpu.memory_space<vmem>>, vector<192x168xbf16>
    %cst = arith.constant dense<0.000000e+00> : vector<16x168xf32>
    %2 = tpu.matmul %0, %1, %cst {dimension_numbers = #tpu.dot_dimension_numbers<[1], [0], [0], [1], [0, 0, 1, 1], [], []>} : vector<16x192xbf16>, vector<192x168xbf16>, vector<16x168xf32> -> vector<16x168xf32>
    %c0_3 = arith.constant 0 : index
    %c0_4 = arith.constant 0 : index
    %3 = vector.load %arg3[%c0_3, %c0_4] : memref<16x32xbf16, #tpu.memory_space<vmem>>, vector<16x32xbf16>
    %c0_5 = arith.constant 0 : index
    %c0_6 = arith.constant 0 : index
    %4 = vector.load %arg6[%c0_5, %c0_6] : memref<16x128xbf16, #tpu.memory_space<vmem>>, vector<16x32xbf16>
    tpu.vector_store %arg6[%c0_5, %c0_6], %3 {strides = array<i32>} : memref<16x128xbf16, #tpu.memory_space<vmem>>, vector<16x32xbf16>,
    %5 = vector.extract_strided_slice %2 {offsets = [0, 0], sizes = [16, 8], strides = [1, 1]} : vector<16x168xf32> to vector<16x8xf32>
    %6 = vector.extract_strided_slice %2 {offsets = [0, 8], sizes = [16, 8], strides = [1, 1]} : vector<16x168xf32> to vector<16x8xf32>
    %7 = vector.extract_strided_slice %2 {offsets = [0, 16], sizes = [16, 8], strides = [1, 1]} : vector<16x168xf32> to vector<16x8xf32>
    %8 = vector.extract_strided_slice %2 {offsets = [0, 24], sizes = [16, 8], strides = [1, 1]} : vector<16x168xf32> to vector<16x8xf32>
    %9 = vector.extract_strided_slice %2 {offsets = [0, 32], sizes = [16, 8], strides = [1, 1]} : vector<16x168xf32> to vector<16x8xf32>
    %10 = vector.extract_strided_slice %2 {offsets = [0, 40], sizes = [16, 8], strides = [1, 1]} : vector<16x168xf32> to vector<16x8xf32>
    %11 = vector.extract_strided_slice %2 {offsets = [0, 48], sizes = [16, 8], strides = [1, 1]} : vector<16x168xf32> to vector<16x8xf32>
    %12 = vector.extract_strided_slice %2 {offsets = [0, 56], sizes = [16, 8], strides = [1, 1]} : vector<16x168xf32> to vector<16x8xf32>
    %13 = vector.extract_strided_slice %2 {offsets = [0, 64], sizes = [16, 8], strides = [1, 1]} : vector<16x168xf32> to vector<16x8xf32>
    %14 = vector.extract_strided_slice %2 {offsets = [0, 72], sizes = [16, 8], strides = [1, 1]} : vector<16x168xf32> to vector<16x8xf32>
    %15 = vector.extract_strided_slice %2 {offsets = [0, 80], sizes = [16, 8], strides = [1, 1]} : vector<16x168xf32> to vector<16x8xf32>
    %16 = arith.maximumf %5, %6 : vector<16x8xf32>
    %17 = arith.maximumf %7, %8 : vector<16x8xf32>
    %18 = arith.maximumf %9, %10 : vector<16x8xf32>
    %19 = arith.maximumf %11, %12 : vector<16x8xf32>
    %20 = arith.maximumf %13, %14 : vector<16x8xf32>
    %21 = arith.maximumf %16, %17 : vector<16x8xf32>
    %22 = arith.maximumf %18, %19 : vector<16x8xf32>
    %23 = arith.maximumf %20, %15 : vector<16x8xf32>
    %24 = arith.maximumf %21, %22 : vector<16x8xf32>
    %25 = arith.maximumf %24, %23 : vector<16x8xf32>
    %c0_7 = arith.constant 0 : index
    %c0_8 = arith.constant 0 : index
    %26 = vector.load %arg5[%c0_7, %c0_8] : memref<1x16xf32, #tpu.memory_space<vmem>>, vector<1x8xf32>
    %27 = vector.broadcast %26 : vector<1x8xf32> to vector<16x8xf32>
    %28 = arith.addf %25, %27 : vector<16x8xf32>
    %29 = math.tanh %28 : vector<16x8xf32>
    %30 = arith.truncf %29 : vector<16x8xf32> to vector<16x8xbf16>
    %c0_9 = arith.constant 0 : index
    %c32 = arith.constant 32 : index
    %31 = vector.load %arg6[%c0_9, %c32] : memref<16x128xbf16, #tpu.memory_space<vmem>>, vector<16x8xbf16>
    tpu.vector_store %arg6[%c0_9, %c32], %30 {strides = array<i32>} : memref<16x128xbf16, #tpu.memory_space<vmem>>, vector<16x8xbf16>,
    %32 = vector.extract_strided_slice %2 {offsets = [0, 88], sizes = [16, 8], strides = [1, 1]} : vector<16x168xf32> to vector<16x8xf32>
    %33 = vector.extract_strided_slice %2 {offsets = [0, 96], sizes = [16, 8], strides = [1, 1]} : vector<16x168xf32> to vector<16x8xf32>
    %34 = vector.extract_strided_slice %2 {offsets = [0, 104], sizes = [16, 8], strides = [1, 1]} : vector<16x168xf32> to vector<16x8xf32>
    %35 = vector.extract_strided_slice %2 {offsets = [0, 112], sizes = [16, 8], strides = [1, 1]} : vector<16x168xf32> to vector<16x8xf32>
    %36 = vector.extract_strided_slice %2 {offsets = [0, 120], sizes = [16, 8], strides = [1, 1]} : vector<16x168xf32> to vector<16x8xf32>
    %37 = vector.extract_strided_slice %2 {offsets = [0, 128], sizes = [16, 8], strides = [1, 1]} : vector<16x168xf32> to vector<16x8xf32>
    %38 = vector.extract_strided_slice %2 {offsets = [0, 136], sizes = [16, 8], strides = [1, 1]} : vector<16x168xf32> to vector<16x8xf32>
    %39 = vector.extract_strided_slice %2 {offsets = [0, 144], sizes = [16, 8], strides = [1, 1]} : vector<16x168xf32> to vector<16x8xf32>
    %40 = vector.extract_strided_slice %2 {offsets = [0, 152], sizes = [16, 8], strides = [1, 1]} : vector<16x168xf32> to vector<16x8xf32>
    %41 = vector.extract_strided_slice %2 {offsets = [0, 160], sizes = [16, 8], strides = [1, 1]} : vector<16x168xf32> to vector<16x8xf32>
    %42 = arith.maximumf %32, %33 : vector<16x8xf32>
    %43 = arith.maximumf %34, %35 : vector<16x8xf32>
    %44 = arith.maximumf %36, %37 : vector<16x8xf32>
    %45 = arith.maximumf %38, %39 : vector<16x8xf32>
    %46 = arith.maximumf %40, %41 : vector<16x8xf32>
    %47 = arith.maximumf %42, %43 : vector<16x8xf32>
    %48 = arith.maximumf %44, %45 : vector<16x8xf32>
    %49 = arith.maximumf %47, %48 : vector<16x8xf32>
    %50 = arith.maximumf %49, %46 : vector<16x8xf32>
    %c0_10 = arith.constant 0 : index
    %c8 = arith.constant 8 : index
    %51 = vector.load %arg5[%c0_10, %c8] : memref<1x16xf32, #tpu.memory_space<vmem>>, vector<1x8xf32>
    %52 = vector.broadcast %51 : vector<1x8xf32> to vector<16x8xf32>
    %53 = arith.addf %50, %52 : vector<16x8xf32>
    %54 = math.tanh %53 : vector<16x8xf32>
    %55 = arith.truncf %54 : vector<16x8xf32> to vector<16x8xbf16>
    %c0_11 = arith.constant 0 : index
    %c40 = arith.constant 40 : index
    %56 = vector.load %arg6[%c0_11, %c40] : memref<16x128xbf16, #tpu.memory_space<vmem>>, vector<16x8xbf16>
    tpu.vector_store %arg6[%c0_11, %c40], %55 {strides = array<i32>} : memref<16x128xbf16, #tpu.memory_space<vmem>>, vector<16x8xbf16>,
    %cst_12 = arith.constant 0.000000e+00 : bf16
    %57 = vector.broadcast %cst_12 : bf16 to vector<16x80xbf16>
    %c0_13 = arith.constant 0 : index
    %c48 = arith.constant 48 : index
    %58 = vector.load %arg6[%c0_13, %c48] : memref<16x128xbf16, #tpu.memory_space<vmem>>, vector<16x80xbf16>
    tpu.vector_store %arg6[%c0_13, %c48], %57 {strides = array<i32>} : memref<16x128xbf16, #tpu.memory_space<vmem>>, vector<16x80xbf16>,
    %c0_14 = arith.constant 0 : index
    %c0_15 = arith.constant 0 : index
    %59 = vector.load %arg6[%c0_14, %c0_15] : memref<16x128xbf16, #tpu.memory_space<vmem>>, vector<16x128xbf16>
    %60 = arith.extf %59 : vector<16x128xbf16> to vector<16x128xf32>
    %c0_16 = arith.constant 0 : index
    %c0_17 = arith.constant 0 : index
    %61 = vector.load %arg1[%c0_16, %c0_17] : memref<8x16xf32, #tpu.memory_space<vmem>>, vector<8x16xf32>
    %cst_18 = arith.constant dense<0.000000e+00> : vector<8x128xf32>
    %62 = tpu.matmul %61, %60, %cst_18 {dimension_numbers = #tpu.dot_dimension_numbers<[1], [0], [0], [1], [0, 0, 1, 1], [], []>} : vector<8x16xf32>, vector<16x128xf32>, vector<8x128xf32> -> vector<8x128xf32>
    %c0_19 = arith.constant 0 : index
    %c0_20 = arith.constant 0 : index
    %63 = vector.load %arg7[%c0_19, %c0_20] : memref<16x128xf32, #tpu.memory_space<vmem>>, vector<8x128xf32>
    tpu.vector_store %arg7[%c0_19, %c0_20], %62 {strides = array<i32>} : memref<16x128xf32, #tpu.memory_space<vmem>>, vector<8x128xf32>,
    %64 = arith.mulf %60, %60 : vector<16x128xf32>
    %cst_21 = arith.constant dense<0.000000e+00> : vector<8x128xf32>
    %65 = tpu.matmul %61, %64, %cst_21 {dimension_numbers = #tpu.dot_dimension_numbers<[1], [0], [0], [1], [0, 0, 1, 1], [], []>} : vector<8x16xf32>, vector<16x128xf32>, vector<8x128xf32> -> vector<8x128xf32>
    %c8_22 = arith.constant 8 : index
    %c0_23 = arith.constant 0 : index
    %66 = vector.load %arg7[%c8_22, %c0_23] : memref<16x128xf32, #tpu.memory_space<vmem>>, vector<8x128xf32>
    tpu.vector_store %arg7[%c8_22, %c0_23], %65 {strides = array<i32>} : memref<16x128xf32, #tpu.memory_space<vmem>>, vector<8x128xf32>,
    return
  }
  func.func @transform_0(%arg0: i32) -> (i32, i32) {
    %c0_i32 = arith.constant 0 : i32
    %c0_i32_0 = arith.constant 0 : i32
    return %c0_i32, %arg0 : i32, i32
  }
  func.func @transform_1(%arg0: i32) -> (i32, i32) {
    %c0_i32 = arith.constant 0 : i32
    %c0_i32_0 = arith.constant 0 : i32
    return %arg0, %c0_i32 : i32, i32
  }
  func.func @transform_2(%arg0: i32) -> (i32, i32) {
    %c0_i32 = arith.constant 0 : i32
    %c0_i32_0 = arith.constant 0 : i32
    return %arg0, %c0_i32 : i32, i32
  }
  func.func @transform_3(%arg0: i32) -> (i32, i32) {
    %c0_i32 = arith.constant 0 : i32
    %c0_i32_0 = arith.constant 0 : i32
    %c0_i32_1 = arith.constant 0 : i32
    return %c0_i32, %c0_i32_0 : i32, i32
  }
  func.func @transform_4(%arg0: i32) -> (i32, i32) {
    %c0_i32 = arith.constant 0 : i32
    %c0_i32_0 = arith.constant 0 : i32
    %c0_i32_1 = arith.constant 0 : i32
    return %c0_i32, %c0_i32_0 : i32, i32
  }
  func.func @transform_5(%arg0: i32) -> (i32, i32) {
    %c0_i32 = arith.constant 0 : i32
    %c0_i32_0 = arith.constant 0 : i32
    return %arg0, %c0_i32 : i32, i32
  }
  func.func @transform_6(%arg0: i32) -> (i32, i32) {
    %c0_i32 = arith.constant 0 : i32
    %c0_i32_0 = arith.constant 0 : i32
    return %arg0, %c0_i32 : i32, i32
  }
}

module attributes {stable_mosaic.version = 11 : i64} {
  func.func @_bn_highway_kernel(%arg0: i32, %arg1: memref<16x128xbf16, #tpu.memory_space<vmem>>, %arg2: memref<16x1xf32, #tpu.memory_space<vmem>>, %arg3: memref<16x1xf32, #tpu.memory_space<vmem>>, %arg4: memref<3x128x256xbf16, #tpu.memory_space<vmem>>, %arg5: memref<3x1x256xf32, #tpu.memory_space<vmem>>, %arg6: memref<16x128xf32, #tpu.memory_space<vmem>>) attributes {dimension_semantics = [#tpu.dimension_semantics<parallel>], iteration_bounds = array<i64: 1>, scalar_prefetch = 0 : i64, scratch_operands = 0 : i64, tpu.core_type = #tpu.core_type<tc>, window_params = [{transform_indices = @transform_0, window_bounds = array<i64: 16, 128>}, {transform_indices = @transform_1, window_bounds = array<i64: 16, 1>}, {transform_indices = @transform_2, window_bounds = array<i64: 16, 1>}, {pipeline_mode = #tpu.pipeline_mode<synchronous>, transform_indices = @transform_3, window_bounds = array<i64: 3, 128, 256>}, {pipeline_mode = #tpu.pipeline_mode<synchronous>, transform_indices = @transform_4, window_bounds = array<i64: 3, 1, 256>}, {transform_indices = @transform_5, window_bounds = array<i64: 16, 128>}]} {
    %c0 = arith.constant 0 : index
    %c0_0 = arith.constant 0 : index
    %0 = vector.load %arg1[%c0, %c0_0] : memref<16x128xbf16, #tpu.memory_space<vmem>>, vector<16x128xbf16>
    %1 = arith.extf %0 : vector<16x128xbf16> to vector<16x128xf32>
    %c0_1 = arith.constant 0 : index
    %c0_2 = arith.constant 0 : index
    %2 = vector.load %arg2[%c0_1, %c0_2] : memref<16x1xf32, #tpu.memory_space<vmem>>, vector<16x1xf32>
    %3 = vector.broadcast %2 : vector<16x1xf32> to vector<16x128xf32>
    %4 = arith.mulf %1, %3 : vector<16x128xf32>
    %c0_3 = arith.constant 0 : index
    %c0_4 = arith.constant 0 : index
    %5 = vector.load %arg3[%c0_3, %c0_4] : memref<16x1xf32, #tpu.memory_space<vmem>>, vector<16x1xf32>
    %6 = vector.broadcast %5 : vector<16x1xf32> to vector<16x128xf32>
    %7 = arith.addf %4, %6 : vector<16x128xf32>
    %8 = arith.truncf %7 : vector<16x128xf32> to vector<16x128xbf16>
    %c0_5 = arith.constant 0 : index
    %c0_6 = arith.constant 0 : index
    %c0_7 = arith.constant 0 : index
    %9 = vector.load %arg4[%c0_5, %c0_6, %c0_7] : memref<3x128x256xbf16, #tpu.memory_space<vmem>>, vector<1x128x256xbf16>
    %10 = vector.shape_cast %9 : vector<1x128x256xbf16> to vector<128x256xbf16>
    %cst = arith.constant dense<0.000000e+00> : vector<16x256xf32>
    %11 = tpu.matmul %8, %10, %cst {dimension_numbers = #tpu.dot_dimension_numbers<[1], [0], [0], [1], [0, 0, 1, 1], [], []>} : vector<16x128xbf16>, vector<128x256xbf16>, vector<16x256xf32> -> vector<16x256xf32>
    %c0_8 = arith.constant 0 : index
    %c0_9 = arith.constant 0 : index
    %c0_10 = arith.constant 0 : index
    %12 = vector.load %arg5[%c0_8, %c0_9, %c0_10] : memref<3x1x256xf32, #tpu.memory_space<vmem>>, vector<1x1x256xf32>
    %13 = vector.shape_cast %12 : vector<1x1x256xf32> to vector<1x256xf32>
    %14 = vector.broadcast %13 : vector<1x256xf32> to vector<16x256xf32>
    %15 = arith.addf %11, %14 : vector<16x256xf32>
    %16 = vector.extract_strided_slice %15 {offsets = [0, 0], sizes = [16, 128], strides = [1, 1]} : vector<16x256xf32> to vector<16x128xf32>
    %17 = arith.negf %16 : vector<16x128xf32>
    %18 = math.exp %17 : vector<16x128xf32>
    %cst_11 = arith.constant 1.000000e+00 : f32
    %19 = vector.broadcast %cst_11 : f32 to vector<16x128xf32>
    %20 = arith.addf %19, %18 : vector<16x128xf32>
    %21 = arith.divf %19, %20 : vector<16x128xf32>
    %22 = vector.extract_strided_slice %15 {offsets = [0, 128], sizes = [16, 128], strides = [1, 1]} : vector<16x256xf32> to vector<16x128xf32>
    %cst_12 = arith.constant 0.000000e+00 : f32
    %23 = vector.broadcast %cst_12 : f32 to vector<16x128xf32>
    %24 = arith.maximumf %22, %23 : vector<16x128xf32>
    %25 = arith.subf %24, %7 : vector<16x128xf32>
    %26 = arith.mulf %21, %25 : vector<16x128xf32>
    %27 = arith.addf %7, %26 : vector<16x128xf32>
    %28 = arith.truncf %27 : vector<16x128xf32> to vector<16x128xbf16>
    %c1 = arith.constant 1 : index
    %c0_13 = arith.constant 0 : index
    %c0_14 = arith.constant 0 : index
    %29 = vector.load %arg4[%c1, %c0_13, %c0_14] : memref<3x128x256xbf16, #tpu.memory_space<vmem>>, vector<1x128x256xbf16>
    %30 = vector.shape_cast %29 : vector<1x128x256xbf16> to vector<128x256xbf16>
    %cst_15 = arith.constant dense<0.000000e+00> : vector<16x256xf32>
    %31 = tpu.matmul %28, %30, %cst_15 {dimension_numbers = #tpu.dot_dimension_numbers<[1], [0], [0], [1], [0, 0, 1, 1], [], []>} : vector<16x128xbf16>, vector<128x256xbf16>, vector<16x256xf32> -> vector<16x256xf32>
    %c1_16 = arith.constant 1 : index
    %c0_17 = arith.constant 0 : index
    %c0_18 = arith.constant 0 : index
    %32 = vector.load %arg5[%c1_16, %c0_17, %c0_18] : memref<3x1x256xf32, #tpu.memory_space<vmem>>, vector<1x1x256xf32>
    %33 = vector.shape_cast %32 : vector<1x1x256xf32> to vector<1x256xf32>
    %34 = vector.broadcast %33 : vector<1x256xf32> to vector<16x256xf32>
    %35 = arith.addf %31, %34 : vector<16x256xf32>
    %36 = vector.extract_strided_slice %35 {offsets = [0, 0], sizes = [16, 128], strides = [1, 1]} : vector<16x256xf32> to vector<16x128xf32>
    %37 = arith.negf %36 : vector<16x128xf32>
    %38 = math.exp %37 : vector<16x128xf32>
    %cst_19 = arith.constant 1.000000e+00 : f32
    %39 = vector.broadcast %cst_19 : f32 to vector<16x128xf32>
    %40 = arith.addf %39, %38 : vector<16x128xf32>
    %41 = arith.divf %39, %40 : vector<16x128xf32>
    %42 = vector.extract_strided_slice %35 {offsets = [0, 128], sizes = [16, 128], strides = [1, 1]} : vector<16x256xf32> to vector<16x128xf32>
    %cst_20 = arith.constant 0.000000e+00 : f32
    %43 = vector.broadcast %cst_20 : f32 to vector<16x128xf32>
    %44 = arith.maximumf %42, %43 : vector<16x128xf32>
    %45 = arith.subf %44, %27 : vector<16x128xf32>
    %46 = arith.mulf %41, %45 : vector<16x128xf32>
    %47 = arith.addf %27, %46 : vector<16x128xf32>
    %48 = arith.truncf %47 : vector<16x128xf32> to vector<16x128xbf16>
    %c2 = arith.constant 2 : index
    %c0_21 = arith.constant 0 : index
    %c0_22 = arith.constant 0 : index
    %49 = vector.load %arg4[%c2, %c0_21, %c0_22] : memref<3x128x256xbf16, #tpu.memory_space<vmem>>, vector<1x128x256xbf16>
    %50 = vector.shape_cast %49 : vector<1x128x256xbf16> to vector<128x256xbf16>
    %cst_23 = arith.constant dense<0.000000e+00> : vector<16x256xf32>
    %51 = tpu.matmul %48, %50, %cst_23 {dimension_numbers = #tpu.dot_dimension_numbers<[1], [0], [0], [1], [0, 0, 1, 1], [], []>} : vector<16x128xbf16>, vector<128x256xbf16>, vector<16x256xf32> -> vector<16x256xf32>
    %c2_24 = arith.constant 2 : index
    %c0_25 = arith.constant 0 : index
    %c0_26 = arith.constant 0 : index
    %52 = vector.load %arg5[%c2_24, %c0_25, %c0_26] : memref<3x1x256xf32, #tpu.memory_space<vmem>>, vector<1x1x256xf32>
    %53 = vector.shape_cast %52 : vector<1x1x256xf32> to vector<1x256xf32>
    %54 = vector.broadcast %53 : vector<1x256xf32> to vector<16x256xf32>
    %55 = arith.addf %51, %54 : vector<16x256xf32>
    %56 = vector.extract_strided_slice %55 {offsets = [0, 0], sizes = [16, 128], strides = [1, 1]} : vector<16x256xf32> to vector<16x128xf32>
    %57 = arith.negf %56 : vector<16x128xf32>
    %58 = math.exp %57 : vector<16x128xf32>
    %cst_27 = arith.constant 1.000000e+00 : f32
    %59 = vector.broadcast %cst_27 : f32 to vector<16x128xf32>
    %60 = arith.addf %59, %58 : vector<16x128xf32>
    %61 = arith.divf %59, %60 : vector<16x128xf32>
    %62 = vector.extract_strided_slice %55 {offsets = [0, 128], sizes = [16, 128], strides = [1, 1]} : vector<16x256xf32> to vector<16x128xf32>
    %cst_28 = arith.constant 0.000000e+00 : f32
    %63 = vector.broadcast %cst_28 : f32 to vector<16x128xf32>
    %64 = arith.maximumf %62, %63 : vector<16x128xf32>
    %65 = arith.subf %64, %47 : vector<16x128xf32>
    %66 = arith.mulf %61, %65 : vector<16x128xf32>
    %67 = arith.addf %47, %66 : vector<16x128xf32>
    %c0_29 = arith.constant 0 : index
    %c0_30 = arith.constant 0 : index
    %68 = vector.load %arg6[%c0_29, %c0_30] : memref<16x128xf32, #tpu.memory_space<vmem>>, vector<16x128xf32>
    tpu.vector_store %arg6[%c0_29, %c0_30], %67 {strides = array<i32>} : memref<16x128xf32, #tpu.memory_space<vmem>>, vector<16x128xf32>,
    return
  }
  func.func @transform_0(%arg0: i32) -> (i32, i32) {
    %c0_i32 = arith.constant 0 : i32
    %c0_i32_0 = arith.constant 0 : i32
    return %arg0, %c0_i32 : i32, i32
  }
  func.func @transform_1(%arg0: i32) -> (i32, i32) {
    %c0_i32 = arith.constant 0 : i32
    %c0_i32_0 = arith.constant 0 : i32
    return %arg0, %c0_i32 : i32, i32
  }
  func.func @transform_2(%arg0: i32) -> (i32, i32) {
    %c0_i32 = arith.constant 0 : i32
    %c0_i32_0 = arith.constant 0 : i32
    return %arg0, %c0_i32 : i32, i32
  }
  func.func @transform_3(%arg0: i32) -> (i32, i32, i32) {
    %c0_i32 = arith.constant 0 : i32
    %c0_i32_0 = arith.constant 0 : i32
    %c0_i32_1 = arith.constant 0 : i32
    %c0_i32_2 = arith.constant 0 : i32
    return %c0_i32, %c0_i32_0, %c0_i32_1 : i32, i32, i32
  }
  func.func @transform_4(%arg0: i32) -> (i32, i32, i32) {
    %c0_i32 = arith.constant 0 : i32
    %c0_i32_0 = arith.constant 0 : i32
    %c0_i32_1 = arith.constant 0 : i32
    %c0_i32_2 = arith.constant 0 : i32
    return %c0_i32, %c0_i32_0, %c0_i32_1 : i32, i32, i32
  }
  func.func @transform_5(%arg0: i32) -> (i32, i32) {
    %c0_i32 = arith.constant 0 : i32
    %c0_i32_0 = arith.constant 0 : i32
    return %arg0, %c0_i32 : i32, i32
  }
}

</mosaic_0001>

<bundles_post_ra>
// kernel: tile.17
= control target key start
LH: loop header
LB: loop body
LE: loop exit
PB: predicated region body
PF: predicated region fallthrough
CT: control target
= control target key end

     0   :  { %s22_s0 = inlined_call_operand.vmem [shape: f32[8], index: 0, kind: input, shape index: {}]   ;;  %s23_s1 = inlined_call_operand.vmem [shape: f32[2,8], index: 1, kind: output, shape index: {}]  }
   0x1   :  { %v4_v0 = vld [vmem:[%s22_s0] ss:$0 sm:$0xff] }
   0x2   :  { %5 = vst [vmem:[%s23_s1] sm:$0x3] %v4_v0 }

// kernel: tile.0
= control target key start
LH: loop header
LB: loop body
LE: loop exit
PB: predicated region body
PF: predicated region fallthrough
CT: control target
= control target key end

     0   :  { %s135_s0 = inlined_call_operand.vmem [shape: f32[2,8], index: 0, kind: input, shape index: {}]   ;;  %s136_s1 = inlined_call_operand.hbm [shape: f32[16,1], index: 1, kind: output, shape index: {}]  }
   0x1   :  { %v5_v0 = vld [vmem:[%s135_s0] sm:$0x3] }
   0x2   :  { %6 = vst [vmem:[#allocation2] sm:$0x3] %v5_v0 }
   0x3   :  { %2 = vsyncpa [#allocation1], 0  ;;  %s94_s0 = smov 127   ;;  %s95_s8 = smov 125   ;;  %vm8_vm0 = vcmask 7168  }
   0x4   :  { %s96_s9 = smov 126   ;;  %s97_s10 = smov 124  }
   0x5   :  { %s98_s11 = smov 123   ;;  %s99_s12 = smov 122  }
   0x6   :  { %s100_s13 = smov 121   ;;  %s101_s14 = smov [#allocation0]  }
   0x7   :  { %s56_s15 = sshll.u32 %s101_s14, 4  ;;  %s57_s15 = int_to_ptr.vmem [resolvable:$true] %s56_s15 }
   0x8   :  { %s70_s16 = scalar_lea.vmem %s57_s15, 256  ;;  %p75_p1 = scmp.lt.s32.totalorder %s57_s15, %s57_s15 }
   0x9   :  { %v10_v1 = vld [vmem:[#allocation2] sm:$0x3]   ;;  %p71_p0 = scmp.ne.s32.totalorder %s57_s15, %s70_s16  ;;  %p76_p2 = scmp.lt.s32.totalorder %s70_s16, %s70_s16 }
   0xa   :  { %v22_v2 = vld [vmem:[#allocation2] sm:$0x3]   ;;  %11 = vrot.lane.b32.xlu0 %v10_v1, %s94_s0 }
   0xb   :  { %23 = vrot.lane.b32.xlu1 %v22_v2, %s95_s8  ;;  %v16_v3 = vld [vmem:[#allocation2] sm:$0x3]   ;;  %p77_p3 = por %p76_p2, %p75_p1 }
   0xc   :  { %v28_v4 = vld [vmem:[#allocation2] sm:$0x3]  }
   0xd   :  { %v7_v5 = vld [vmem:[#allocation2] sm:$0x3]   ;;  %p78_p4 = pnand %p77_p3, %p71_p0 }
   0xe   :  { %9 = vst.msk [vmem:[#allocation0] ss:$8 sm:$0x3] %vm8_vm0, %v7_v5   ;;  %17 = vrot.lane.b32.xlu0 %v16_v3, %s96_s9  ;;  %v34_v6 = vld [vmem:[#allocation2] sm:$0x3]  }
   0xf   :  { %29 = vrot.lane.b32.xlu1 %v28_v4, %s97_s10  ;;  %v40_v7 = vld [vmem:[#allocation2] sm:$0x3]  }
  0x10   :  { %v46_v8 = vld [vmem:[#allocation2] sm:$0x3]  }
  0x12   :  { %35 = vrot.lane.b32.xlu0 %v34_v6, %s98_s11 }
  0x13   :  { %41 = vrot.lane.b32.xlu1 %v40_v7, %s99_s12 }
  0x16   :  { %47 = vrot.lane.b32.xlu0 %v46_v8, %s100_s13 }
  0x7c   :  { %v12_v9 = vpop.permute.xlu0 %11  }
  0x7d   :  { %v24_v10 = vpop.permute.xlu1 %23   ;;  %15 = vst.msk [vmem:[#allocation0 + $0x1] ss:$8 sm:$0x3] %vm8_vm0, %v12_v9  }
  0x7e   :  { %27 = vst.msk [vmem:[#allocation0 + $0x3] ss:$8 sm:$0x3] %vm8_vm0, %v24_v10  }
  0x80   :  { %v18_v11 = vpop.permute.xlu0 %17  }
  0x81   :  { %v30_v12 = vpop.permute.xlu1 %29   ;;  %21 = vst.msk [vmem:[#allocation0 + $0x2] ss:$8 sm:$0x3] %vm8_vm0, %v18_v11  }
  0x82   :  { %33 = vst.msk [vmem:[#allocation0 + $0x4] ss:$8 sm:$0x3] %vm8_vm0, %v30_v12  }
  0x84   :  { %v36_v13 = vpop.permute.xlu0 %35  }
  0x85   :  { %v42_v14 = vpop.permute.xlu1 %41   ;;  %39 = vst.msk [vmem:[#allocation0 + $0x5] ss:$8 sm:$0x3] %vm8_vm0, %v36_v13  }
  0x86   :  { %45 = vst.msk [vmem:[#allocation0 + $0x6] ss:$8 sm:$0x3] %vm8_vm0, %v42_v14  }
  0x88   :  { %v48_v15 = vpop.permute.xlu0 %47  }
  0x89   :  { %51 = vst.msk [vmem:[#allocation0 + $0x7] ss:$8 sm:$0x3] %vm8_vm0, %v48_v15  }
  0x8a   :  { %81 = shalt.err (!%p78_p4)
}
  0x8b   :  { %s82_s19 = scalar_lea.hbm %s136_s1, 256 }
  0x8c   :  { %p83_p5 = scmp.ne.s32.totalorder %s136_s1, %s82_s19  ;;  %p86_p6 = scmp.lt.u32.totalorder %s82_s19, %s136_s1 }
  0x8e   :  { %p88_p7 = pnand %p86_p6, %p83_p5 }
  0x90   :  { %91 = shalt.err (!%p88_p7)
}
  0x91   :  { %59 = dma.vmem_to_hbm [thread:$0]  %s57_s15, 256, %s136_s1, [#allocation1]  }
  0x92   :  { %92 = dma.done.wait [#allocation1], 256  }
  0x93   :  { %93 = vsyncadd [#allocation1], 4294967040 }
  0x94   :  { %61 = vsyncpa [#allocation1], 1 }

// kernel: word_char_embedding_forward.2
= control target key start
LH: loop header
LB: loop body
LE: loop exit
PB: predicated region body
PF: predicated region fallthrough
CT: control target
= control target key end

     0   :  { %12 = vsyncpa [#allocation3], 0  ;;  %s1094_s0 = inlined_call_operand.hbm [shape: f32[8,16], index: 0, kind: input, shape index: {}]   ;;  %s1095_s1 = inlined_call_operand.hbm [shape: bf16[16,192], index: 1, kind: input, shape index: {}]   ;;  %s1096_s2 = inlined_call_operand.hbm [shape: bf16[16,32], index: 2, kind: input, shape index: {}]   ;;  %s1097_s3 = inlined_call_operand.hbm [shape: bf16[192,168], index: 3, kind: input, shape index: {}]   ;;  %s1098_s4 = inlined_call_operand.hbm [shape: f32[1,16], index: 4, kind: input, shape index: {}]   ;;  %s1099_s5 = inlined_call_operand.hbm [shape: bf16[16,128], index: 5, kind: output, shape index: {0}]   ;;  %s1100_s6 = inlined_call_operand.hbm [shape: f32[16,128], index: 6, kind: output, shape index: {1}]  }
   0x1   :  { %13 = vsyncpa [#allocation6], 0 }
   0x2   :  { %14 = vsyncpa [#allocation9], 0 }
   0x3   :  { %15 = vsyncpa [#allocation4], 0 }
   0x4   :  { %16 = vsyncpa [#allocation13], 0  ;;  %s929_s21 = smov [#allocation5]   ;;  %s765_s25 = scalar_lea.hbm %s1095_s1, 256 }
   0x5   :  { %s32_s22 = sshll.u32 %s929_s21, 4  ;;  %p766_p0 = scmp.ne.s32.totalorder %s1095_s1, %s765_s25  ;;  %s33_s22 = int_to_ptr.vmem [resolvable:$true] %s32_s22 }
   0x6   :  { %p769_p1 = scmp.lt.u32.totalorder %s765_s25, %s1095_s1 }
   0x8   :  { %p771_p2 = pnand %p769_p1, %p766_p0 }
   0xa   :  { %774 = shalt.err (!%p771_p2)
}
   0xb   :  { %s775_s30 = scalar_lea.vmem %s33_s22, 256  ;;  %p780_p4 = scmp.lt.s32.totalorder %s33_s22, %s33_s22 }
   0xc   :  { %p776_p3 = scmp.ne.s32.totalorder %s33_s22, %s775_s30  ;;  %p781_p5 = scmp.lt.s32.totalorder %s775_s30, %s775_s30 }
   0xe   :  { %p782_p6 = por %p781_p5, %p780_p4 }
  0x10   :  { %p783_p7 = pnand %p782_p6, %p776_p3 }
  0x12   :  { %786 = shalt.err (!%p783_p7)
}
  0x13   :  { %s930_s7 = smov 128   ;;  %s931_s8 = smov 8  }
  0x14   :  { %38 = dma.hbm_to_vmem [thread:$0]  %s1095_s1, 256, %s33_s22, [#allocation6], %s930_s7, %s930_s7, %s931_s8  }
  0x15   :  { %s932_s11 = smov [#allocation8]   ;;  %s933_s13 = smov [#allocation2]  }
  0x16   :  { %s56_s12 = sshll.u32 %s932_s11, 4  ;;  %s23_s14 = sshll.u32 %s933_s13, 4  ;;  %s57_s12 = int_to_ptr.vmem [resolvable:$true] %s56_s12  ;;  %s24_s14 = int_to_ptr.vmem [resolvable:$true] %s23_s14 }
  0x17   :  { %s787_s17 = scalar_lea.hbm %s1097_s3, 3072 }
  0x18   :  { %p788_p8 = scmp.ne.s32.totalorder %s1097_s3, %s787_s17  ;;  %p791_p9 = scmp.lt.u32.totalorder %s787_s17, %s1097_s3 }
  0x1a   :  { %p793_p10 = pnand %p791_p9, %p788_p8 }
  0x1c   :  { %796 = shalt.err (!%p793_p10)
}
  0x1d   :  { %s797_s1 = scalar_lea.vmem %s57_s12, 3072  ;;  %p802_p12 = scmp.lt.s32.totalorder %s57_s12, %s57_s12 }
  0x1e   :  { %p798_p11 = scmp.ne.s32.totalorder %s57_s12, %s797_s1  ;;  %p803_p13 = scmp.lt.s32.totalorder %s797_s1, %s797_s1 }
  0x20   :  { %p804_p0 = por %p803_p13, %p802_p12 }
  0x22   :  { %p805_p1 = pnand %p804_p0, %p798_p11 }
  0x24   :  { %808 = shalt.err (!%p805_p1)
}
  0x25   :  { %62 = dma.hbm_to_vmem [thread:$0]  %s1097_s3, 3072, %s57_s12, [#allocation9], %s930_s7, %s930_s7, %s931_s8  }
  0x26   :  { %s809_s26 = scalar_lea.hbm %s1094_s0, 128 }
  0x27   :  { %p810_p2 = scmp.ne.s32.totalorder %s1094_s0, %s809_s26  ;;  %p813_p3 = scmp.lt.u32.totalorder %s809_s26, %s1094_s0 }
  0x29   :  { %p815_p4 = pnand %p813_p3, %p810_p2 }
  0x2b   :  { %818 = shalt.err (!%p815_p4)
}
  0x2c   :  { %s819_s9 = scalar_lea.vmem %s24_s14, 128  ;;  %p824_p6 = scmp.lt.s32.totalorder %s24_s14, %s24_s14 }
  0x2d   :  { %p820_p5 = scmp.ne.s32.totalorder %s24_s14, %s819_s9  ;;  %p825_p7 = scmp.lt.s32.totalorder %s819_s9, %s819_s9 }
  0x2f   :  { %p826_p8 = por %p825_p7, %p824_p6 }
  0x31   :  { %p827_p9 = pnand %p826_p8, %p820_p5 }
  0x33   :  { %830 = shalt.err (!%p827_p9)
}
  0x34   :  { %26 = dma.hbm_to_vmem [thread:$0]  %s1094_s0, 128, %s24_s14, [#allocation3]  }
  0x35   :  { %s934_s11 = smov [#allocation7]   ;;  %s831_s16 = scalar_lea.hbm %s1096_s2, 128 }
  0x36   :  { %s44_s12 = sshll.u32 %s934_s11, 4  ;;  %p832_p10 = scmp.ne.s32.totalorder %s1096_s2, %s831_s16  ;;  %s45_s12 = int_to_ptr.vmem [resolvable:$true] %s44_s12 }
  0x37   :  { %p835_p11 = scmp.lt.u32.totalorder %s831_s16, %s1096_s2 }
  0x39   :  { %p837_p12 = pnand %p835_p11, %p832_p10 }
  0x3b   :  { %840 = shalt.err (!%p837_p12)
}
  0x3c   :  { %s841_s21 = scalar_lea.vmem %s45_s12, 128  ;;  %p846_p0 = scmp.lt.s32.totalorder %s45_s12, %s45_s12 }
  0x3d   :  { %p842_p13 = scmp.ne.s32.totalorder %s45_s12, %s841_s21  ;;  %p847_p1 = scmp.lt.s32.totalorder %s841_s21, %s841_s21 }
  0x3f   :  { %p848_p2 = por %p847_p1, %p846_p0 }
  0x41   :  { %p849_p3 = pnand %p848_p2, %p842_p13 }
  0x43   :  { %852 = shalt.err (!%p849_p3)
}
  0x44   :  { %s935_s0 = smov 64   ;;  %s936_s14 = smov 4  }
  0x45   :  { %50 = dma.hbm_to_vmem [thread:$0]  %s1096_s2, 128, %s45_s12, [#allocation6], %s935_s0, %s935_s0, %s936_s14  }
  0x46   :  { %s937_s23 = smov [#allocation10]   ;;  %s853_s27 = scalar_lea.hbm %s1098_s4, 16 }
  0x47   :  { %s69_s24 = sshll.u32 %s937_s23, 4  ;;  %p854_p4 = scmp.ne.s32.totalorder %s1098_s4, %s853_s27  ;;  %s70_s24 = int_to_ptr.vmem [resolvable:$true] %s69_s24 }
  0x48   :  { %p857_p5 = scmp.lt.u32.totalorder %s853_s27, %s1098_s4 }
  0x4a   :  { %p859_p6 = pnand %p857_p5, %p854_p4 }
  0x4c   :  { %862 = shalt.err (!%p859_p6)
}
  0x4d   :  { %s863_s3 = scalar_lea.vmem %s70_s24, 16  ;;  %s867_s2 = scalar_lea.vmem %s70_s24, 32 }
  0x4e   :  { %p864_p7 = scmp.ne.s32.totalorder %s70_s24, %s863_s3  ;;  %p868_p8 = scmp.lt.s32.totalorder %s70_s24, %s70_s24 }
  0x4f   :  { %p869_p9 = scmp.lt.s32.totalorder %s867_s2, %s863_s3 }
  0x51   :  { %p870_p10 = por %p869_p9, %p868_p8 }
  0x53   :  { %p871_p11 = pnand %p870_p10, %p864_p7 }
  0x55   :  { %874 = shalt.err (!%p871_p11)
}
  0x56   :  { %72 = dma.hbm_to_vmem [thread:$0]  %s1098_s4, 16, %s70_s24, [#allocation9]  }
  0x57   :  { %919 = dma.done.wait [#allocation3], 128  }
  0x58   :  { %920 = vsyncadd [#allocation3], 4294967168 }
  0x59   :  { %921 = dma.done.wait [#allocation6], 384  }
  0x5a   :  { %922 = vsyncadd [#allocation6], 4294966912 }
  0x5b   :  { %923 = dma.done.wait [#allocation9], 3088  }
  0x5c   :  { %924 = vsyncadd [#allocation9], 4294964208  ;;  %v718_v0 = vld [vmem:[#allocation8 + $0x4] ss:$8 sps:$4 sm:$0xff]   ;;  %v720_v1 = vld [vmem:[#allocation8] ss:$8 sps:$4 sm:$0xff]  }
  0x5d   :  { %248 = vmatprep.subr.bf16.mxu0 %v718_v0  ;;  %v721_v2 = vld [vmem:[#allocation8 + $0x14] ss:$8 sps:$4 sm:$0xff]   ;;  %v723_v3 = vld [vmem:[#allocation8 + $0x10] ss:$8 sps:$4 sm:$0xff]   ;;  %v724_v4 = vld [vmem:[#allocation8 + $0x24] ss:$8 sps:$4 sm:$0xff]  }
  0x5e   :  { %249 = vmatpush1.bf16.msra.mxu0 %v720_v1  ;;  %v726_v5 = vld [vmem:[#allocation8 + $0x20] ss:$8 sps:$4 sm:$0xff]   ;;  %v727_v6 = vld [vmem:[#allocation8 + $0x34] ss:$8 sps:$4 sm:$0xff]   ;;  %v729_v7 = vld [vmem:[#allocation8 + $0x30] ss:$8 sps:$4 sm:$0xff]  }
  0x5f   :  { %250 = vmatprep.subr.bf16.mxu0 %v721_v2  ;;  %v730_v8 = vld [vmem:[#allocation8 + $0x44] ss:$8 sps:$4 sm:$0xff]   ;;  %v732_v9 = vld [vmem:[#allocation8 + $0x40] ss:$8 sps:$4 sm:$0xff]   ;;  %v733_v10 = vld [vmem:[#allocation8 + $0x54] ss:$8 sps:$4 sm:$0xff]  }
  0x60   :  { %vm244_vm0 = vcmask 523264   ;;  %v756_v11 = vld [vmem:[#allocation5 + $0x4] ss:$8 sps:$4 sm:$0xff]   ;;  %v735_v12 = vld [vmem:[#allocation8 + $0x50] ss:$8 sps:$4 sm:$0xff]   ;;  %s938_s4 = smov 120  }
  0x61   :  { %655 = vmatprep.mubr.msk.bf16.mxu0 %vm244_vm0, %v756_v11  ;;  %v736_v13 = vld [vmem:[#allocation8 + $0x64] ss:$8 sps:$4 sm:$0xff]   ;;  %v738_v14 = vld [vmem:[#allocation8 + $0x60] ss:$8 sps:$4 sm:$0xff]   ;;  %v739_v15 = vld [vmem:[#allocation8 + $0x74] ss:$8 sps:$4 sm:$0xff]  }
  0x62   :  { %251 = vmatpush1.bf16.msra.mxu0 %v723_v3  ;;  %v741_v16 = vld [vmem:[#allocation8 + $0x70] ss:$8 sps:$4 sm:$0xff]   ;;  %v742_v17 = vld [vmem:[#allocation8 + $0x84] ss:$8 sps:$4 sm:$0xff]   ;;  %v744_v18 = vld [vmem:[#allocation8 + $0x80] ss:$8 sps:$4 sm:$0xff]  }
  0x63   :  { %252 = vmatprep.subr.bf16.mxu0 %v724_v4  ;;  %v745_v19 = vld [vmem:[#allocation8 + $0x94] ss:$8 sps:$4 sm:$0xff]   ;;  %v747_v20 = vld [vmem:[#allocation8 + $0x90] ss:$8 sps:$4 sm:$0xff]   ;;  %v748_v21 = vld [vmem:[#allocation8 + $0xa4] ss:$8 sps:$4 sm:$0xff]  }
  0x64   :  { %v750_v22 = vld [vmem:[#allocation8 + $0xa0] ss:$8 sps:$4 sm:$0xff]   ;;  %v751_v23 = vld [vmem:[#allocation8 + $0xb4] ss:$8 sps:$4 sm:$0xff]   ;;  %v753_v24 = vld [vmem:[#allocation8 + $0xb0] ss:$8 sps:$4 sm:$0xff]  }
  0x65   :  { %v754_v25 = vld [vmem:[#allocation5] ss:$8 sps:$4 sm:$0xff]   ;;  %s939_s12 = smov 112   ;;  %s940_s13 = smov 96   ;;  %v659_v52 = vld [vmem:[#allocation10] ss:$0 sm:$0xff] }
  0x66   :  { %253 = vmatpush1.bf16.msra.mxu0 %v726_v5  ;;  %s941_s15 = smov 80   ;;  %v292_v53 = vld [vmem:[#allocation7 + $0x4] sm:$0xf]  ;;  %vm293_vm1 = vcmask 257024   ;;  %v291_v4 = vld [vmem:[#allocation7] sm:$0xf] }
  0x67   :  { %254 = vmatprep.subr.bf16.mxu0 %v727_v6  ;;  %295 = vst.msk [vmem:[#allocation11 + $0x4] sm:$0xf] %vm293_vm1, %v292_v53  ;;  %294 = vst.msk [vmem:[#allocation11] sm:$0xf] %vm293_vm1, %v291_v4  ;;  %s943_s16 = smov 32   ;;  %vm944_vm2 = vmmov 0  }
  0x68   :  { %vm367_vm3 = vcmask 322816   ;;  %vm435_vm4 = vcmask 388416   ;;  %vm438_vm5 = vcmask 1043840   ;;  %vm446_vm6 = vcmask 130048   ;;  %s947_s17 = smov [#allocation11]  }
  0x69   :  { %s599_s18 = sshll.u32 %s947_s17, 4  ;;  %s600_s18 = int_to_ptr.vmem [resolvable:$true] %s599_s18 }
  0x6a   :  { %255 = vmatpush1.bf16.msra.mxu0 %v729_v7  ;;  %s875_s19 = scalar_lea.vmem %s600_s18, 128  ;;  %p880_p13 = scmp.lt.s32.totalorder %s600_s18, %s600_s18 }
  0x6b   :  { %256 = vmatprep.subr.bf16.mxu0 %v730_v8  ;;  %p876_p12 = scmp.ne.s32.totalorder %s600_s18, %s875_s19  ;;  %p881_p0 = scmp.lt.s32.totalorder %s875_s19, %s875_s19 }
  0x6d   :  { %p882_p1 = por %p881_p0, %p880_p13 }
  0x6e   :  { %257 = vmatpush1.bf16.msra.mxu0 %v732_v9 }
  0x6f   :  { %258 = vmatprep.subr.bf16.mxu0 %v733_v10  ;;  %p883_p2 = pnand %p882_p1, %p876_p12 }
  0x72   :  { %259 = vmatpush1.bf16.msra.mxu0 %v735_v12  ;;  %v942_v12 = vmov 0.0|0.0  }
  0x73   :  { %260 = vmatprep.subr.bf16.mxu0 %v736_v13  ;;  %692 = vmatprep.subr.bf16.mxu1 %v942_v12 }
  0x76   :  { %261 = vmatpush1.bf16.msra.mxu0 %v738_v14 }
  0x77   :  { %262 = vmatprep.subr.bf16.mxu0 %v739_v15 }
  0x7a   :  { %263 = vmatpush1.bf16.msra.mxu0 %v741_v16 }
  0x7b   :  { %264 = vmatprep.subr.bf16.mxu0 %v742_v17 }
  0x7e   :  { %265 = vmatpush1.bf16.msra.mxu0 %v744_v18 }
  0x7f   :  { %266 = vmatprep.subr.bf16.mxu0 %v745_v19 }
  0x82   :  { %267 = vmatpush1.bf16.msra.mxu0 %v747_v20 }
  0x83   :  { %268 = vmatprep.subr.bf16.mxu0 %v748_v21  ;;  %v945_v21 = vmov 0.0  }
  0x84   :  { %682 = vmatprep.mubr.msk.f32.mxu1 %vm944_vm2, %v945_v21 }
  0x86   :  { %269 = vmatpush1.bf16.msra.mxu0 %v750_v22 }
  0x87   :  { %270 = vmatprep.subr.bf16.mxu0 %v751_v23 }
  0x8a   :  { %271 = vmatpush1.bf16.msra.mxu0 %v753_v24 }
  0x8d   :  { %281 = vmatmul.mubr.bf16.vlgmr.msra.gmra.mrb[0].mxu0 %v754_v25  ;;  %v946_v25 = vmov 0  }
 0x160   :  { %v282_v26 = vpop.f32.mrb[0].mxu0 }
 0x161   :  { %298 = vrot.lane.b32.xlu0 %v282_v26, %s938_s4  ;;  %v284_v27 = vpop.f32.mrb[1].mxu0 }
 0x162   :  { %372 = vrot.lane.b32.xlu1 %v284_v27, %s938_s4  ;;  %v286_v28 = vpop.f32.mrb[2].mxu0 }
 0x163   :  { %v288_v29 = vpop.f32.mrb[3].mxu0 }
 0x165   :  { %300 = vrot.lane.b32.xlu0 %v286_v28, %s938_s4 }
 0x166   :  { %374 = vrot.lane.b32.xlu1 %v288_v29, %s938_s4 }
 0x1d3   :  { %v299_v30 = vpop.permute.xlu0 %298 }
 0x1d4   :  { %v304_v31 = vmax.f32 %v282_v26, %v299_v30  ;;  %v373_v32 = vpop.permute.xlu1 %372  ;;  %v445_v30 = vld [vmem:[#allocation2] sm:$0xff] }
 0x1d5   :  { %v378_v33 = vmax.f32 %v282_v26, %v373_v32  ;;  %v380_v35 = vmax.f32 %v284_v27, %v373_v32 }
 0x1d6   :  { %308 = vrot.lane.b32.xlu0 %v304_v31, %s939_s12 }
 0x1d7   :  { %v301_v34 = vpop.permute.xlu0 %300 }
 0x1d8   :  { %v305_v36 = vmax.f32 %v286_v28, %v301_v34  ;;  %v375_v37 = vpop.permute.xlu1 %374 }
 0x1d9   :  { %v381_v38 = vmax.f32 %v288_v29, %v375_v37  ;;  %v379_v49 = vmax.f32 %v286_v28, %v375_v37 }
 0x1da   :  { %384 = vrot.lane.b32.xlu0 %v380_v35, %s939_s12  ;;  %310 = vrot.lane.b32.xlu1 %v305_v36, %s939_s12 }
 0x1de   :  { %316 = vrot.lane.b32.xlu0 %v282_v26, %s939_s12  ;;  %386 = vrot.lane.b32.xlu1 %v381_v38, %s939_s12 }
 0x1e2   :  { %318 = vrot.lane.b32.xlu1 %v286_v28, %s939_s12 }
 0x248   :  { %v309_v39 = vpop.permute.xlu0 %308 }
 0x249   :  { %v314_v47 = vmax.f32 %v304_v31, %v309_v39 }
 0x24c   :  { %v385_v40 = vpop.permute.xlu0 %384  ;;  %v311_v41 = vpop.permute.xlu1 %310 }
 0x24d   :  { %v315_v48 = vmax.f32 %v305_v36, %v311_v41  ;;  %v390_v50 = vmax.f32 %v378_v33, %v385_v40 }
 0x250   :  { %v317_v42 = vpop.permute.xlu0 %316  ;;  %v387_v43 = vpop.permute.xlu1 %386 }
 0x251   :  { %v322_v44 = vmax.f32 %v304_v31, %v317_v42  ;;  %v391_v51 = vmax.f32 %v379_v49, %v387_v43 }
 0x253   :  { %336 = vrot.lane.b32.xlu0 %v322_v44, %s935_s0 }
 0x254   :  { %v319_v45 = vpop.permute.xlu1 %318 }
 0x255   :  { %v323_v46 = vmax.f32 %v305_v36, %v319_v45 }
 0x257   :  { %402 = vrot.lane.b32.xlu0 %v380_v35, %s935_s0  ;;  %338 = vrot.lane.b32.xlu1 %v323_v46, %s935_s0 }
 0x25b   :  { %326 = vrot.lane.b32.xlu0 %v314_v47, %s940_s13  ;;  %328 = vrot.lane.b32.xlu1 %v315_v48, %s940_s13 }
 0x25f   :  { %394 = vrot.lane.b32.xlu0 %v390_v50, %s940_s13  ;;  %396 = vrot.lane.b32.xlu1 %v391_v51, %s940_s13 }
 0x263   :  { %416 = vrot.lane.b32.xlu0 %v659_v52, %s941_s15  ;;  %404 = vrot.lane.b32.xlu1 %v381_v38, %s935_s0 }
 0x2c5   :  { %v337_v54 = vpop.permute.xlu0 %336 }
 0x2c9   :  { %v403_v55 = vpop.permute.xlu0 %402  ;;  %v339_v56 = vpop.permute.xlu1 %338 }
 0x2cd   :  { %v327_v57 = vpop.permute.xlu0 %326  ;;  %v329_v58 = vpop.permute.xlu1 %328 }
 0x2ce   :  { %v332_v59 = vmax.f32 %v314_v47, %v327_v57  ;;  %v333_v60 = vmax.f32 %v315_v48, %v329_v58 }
 0x2d0   :  { %v342_v61 = vmax.f32 %v332_v59, %v337_v54  ;;  %v343_v62 = vmax.f32 %v333_v60, %v339_v56 }
 0x2d1   :  { %v395_v63 = vpop.permute.xlu0 %394  ;;  %v397_v0 = vpop.permute.xlu1 %396 }
 0x2d2   :  { %v351_v1 = vadd.f32 %v659_v52, %v342_v61  ;;  %v352_v2 = vadd.f32 %v659_v52, %v343_v62  ;;  %v400_v3 = vmax.f32 %v314_v47, %v395_v63  ;;  %v401_v6 = vmax.f32 %v315_v48, %v397_v0 }
 0x2d4   :  { %757 = vtanh.f32 %v351_v1  ;;  %v408_v5 = vmax.f32 %v400_v3, %v403_v55 }
 0x2d5   :  { %759 = vtanh.f32 %v352_v2  ;;  %v417_v7 = vpop.permute.xlu0 %416  ;;  %v405_v8 = vpop.permute.xlu1 %404 }
 0x2d6   :  { %v419_v9 = vadd.f32 %v417_v7, %v408_v5  ;;  %v409_v10 = vmax.f32 %v401_v6, %v405_v8 }
 0x2d8   :  { %761 = vtanh.f32 %v419_v9  ;;  %v420_v11 = vadd.f32 %v417_v7, %v409_v10 }
 0x2da   :  { %763 = vtanh.f32 %v420_v11 }
 0x2de   :  { %v758_v13 = vpop.eup %757 }
 0x2df   :  { %v760_v14 = vpop.eup %759  ;;  %v664_v15 = vpack.c.bf16 %v758_v13, %v758_v13 }
 0x2e0   :  { %v665_v16 = vpack.c.bf16 %v760_v14, %v760_v14 }
 0x2e1   :  { %361 = vrot.lane.b32.xlu1 %v664_v15, %s943_s16 }
 0x2e2   :  { %v762_v17 = vpop.eup %761  ;;  %363 = vrot.lane.b32.xlu0 %v665_v16, %s943_s16 }
 0x2e3   :  { %v666_v18 = vpack.c.bf16 %v762_v17, %v762_v17 }
 0x2e4   :  { %v764_v19 = vpop.eup %763 }
 0x2e5   :  { %429 = vrot.lane.b32.xlu1 %v666_v18, %s941_s15  ;;  %v667_v20 = vpack.c.bf16 %v764_v19, %v764_v19 }
 0x2e7   :  { %431 = vrot.lane.b32.xlu0 %v667_v20, %s941_s15 }
 0x353   :  { %v362_v22 = vpop.permute.xlu1 %361 }
 0x354   :  { %v364_v23 = vpop.permute.xlu0 %363  ;;  %368 = vst.msk [vmem:[#allocation11] sm:$0xf] %vm367_vm3, %v362_v22 }
 0x355   :  { %369 = vst.msk [vmem:[#allocation11 + $0x4] sm:$0xf] %vm367_vm3, %v364_v23 }
 0x357   :  { %v430_v24 = vpop.permute.xlu1 %429 }
 0x358   :  { %436 = vst.msk [vmem:[#allocation11] sm:$0xf] %vm435_vm4, %v430_v24 }
 0x359   :  { %439 = vst.msk [vmem:[#allocation11] sm:$0xf] %vm438_vm5, %v946_v25  ;;  %v432_v26 = vpop.permute.xlu0 %431 }
 0x35a   :  { %437 = vst.msk [vmem:[#allocation11 + $0x4] sm:$0xf] %vm435_vm4, %v432_v26 }
 0x35b   :  { %440 = vst.msk [vmem:[#allocation11 + $0x4] sm:$0xf] %vm438_vm5, %v946_v25 }
 0x362   :  { %v669_v27 = vld [vmem:[#allocation11] sm:$0xff]  }
 0x363   :  { %v670_v28 = vunpack.c.l.bf16 %v669_v27  ;;  %v671_v29 = vunpack.c.h.bf16 %v669_v27  ;;  %694 = vmatpush3.bf16.msra.mxu1 %v669_v27 }
 0x364   :  { %695 = vmatprep.subr.bf16.mxu1 %v942_v12 }
 0x365   :  { %v521_v31 = vmul.f32 %v670_v28, %v670_v28  ;;  %v522_v32 = vmul.f32 %v671_v29, %v671_v29 }
 0x366   :  { %683 = vmatmul.mubr.msk.f32.vlgmr.msra.gmra.mrb[0].mxu1 %vm446_vm6, %v445_v30 }
 0x367   :  { %v696_v33 = vpack.c.bf16 %v522_v32, %v521_v31  ;;  %689 = vmatprep.mubr.msk.f32.mxu1 %vm944_vm2, %v945_v21 }
 0x369   :  { %697 = vmatpush3.bf16.msra.mxu1 %v696_v33 }
 0x36c   :  { %690 = vmatmul.mubr.msk.f32.vlgmr.msra.gmra.mrb[2].mxu1 %vm446_vm6, %v445_v30 }
 0x36d   :  { %886 = shalt.err (!%p883_p2)
}
 0x36e   :  { %s887_s1 = scalar_lea.hbm %s1099_s5, 128 }
 0x36f   :  { %p888_p3 = scmp.ne.s32.totalorder %s1099_s5, %s887_s1  ;;  %p891_p4 = scmp.lt.u32.totalorder %s887_s1, %s1099_s5 }
 0x371   :  { %p893_p5 = pnand %p891_p4, %p888_p3 }
 0x373   :  { %896 = shalt.err (!%p893_p5)
}
 0x374   :  { %605 = dma.vmem_to_hbm [thread:$0]  %s600_s18, 128, %s1099_s5, [#allocation4], %s935_s0, %s935_s0, %s936_s14  }
 0x375   :  { %s948_s28 = smov [#allocation12]  }
 0x376   :  { %s611_s29 = sshll.u32 %s948_s28, 4  ;;  %s612_s29 = int_to_ptr.vmem [resolvable:$true] %s611_s29 }
 0x377   :  { %s897_s30 = scalar_lea.vmem %s612_s29, 256  ;;  %p902_p7 = scmp.lt.s32.totalorder %s612_s29, %s612_s29 }
 0x378   :  { %p898_p6 = scmp.ne.s32.totalorder %s612_s29, %s897_s30  ;;  %p903_p8 = scmp.lt.s32.totalorder %s897_s30, %s897_s30 }
 0x37a   :  { %p904_p9 = por %p903_p8, %p902_p7 }
 0x37c   :  { %p905_p10 = pnand %p904_p9, %p898_p6 }
 0x439   :  { %v516_v34 = vpop.f32.mrb[0].mxu1 }
 0x43a   :  { %520 = vst [vmem:[#allocation12] sm:$0xff] %v516_v34  ;;  %v684_v35 = vpop.f32.mrb[1].mxu1 }
 0x43f   :  { %v589_v36 = vpop.f32.mrb[2].mxu1 }
 0x440   :  { %593 = vst [vmem:[#allocation12 + $0x8] sm:$0xff] %v589_v36  ;;  %v691_v37 = vpop.f32.mrb[3].mxu1 }
 0x441   :  { %908 = shalt.err (!%p905_p10)
}
 0x442   :  { %s909_s5 = scalar_lea.hbm %s1100_s6, 256 }
 0x443   :  { %p910_p11 = scmp.ne.s32.totalorder %s1100_s6, %s909_s5  ;;  %p913_p12 = scmp.lt.u32.totalorder %s909_s5, %s1100_s6 }
 0x445   :  { %p915_p13 = pnand %p913_p12, %p910_p11 }
 0x447   :  { %918 = shalt.err (!%p915_p13)
}
 0x448   :  { %617 = dma.vmem_to_hbm [thread:$0]  %s612_s29, 256, %s1100_s6, [#allocation13], %s930_s7, %s930_s7, %s931_s8  }
 0x449   :  { %925 = dma.done.wait [#allocation4], 128  }
 0x44a   :  { %926 = vsyncadd [#allocation4], 4294967168 }
 0x44b   :  { %927 = dma.done.wait [#allocation13], 256  }
 0x44c   :  { %928 = vsyncadd [#allocation13], 4294967040 }
 0x44d   :  { %624 = vsyncpa [#allocation3], 1 }
 0x44e   :  { %625 = vsyncpa [#allocation6], 1 }
 0x44f   :  { %626 = vsyncpa [#allocation9], 1 }
 0x450   :  { %627 = vsyncpa [#allocation4], 1 }
 0x451   :  { %628 = vsyncpa [#allocation13], 1 }

// kernel: word_char_embedding_forward.3
= control target key start
LH: loop header
LB: loop body
LE: loop exit
PB: predicated region body
PF: predicated region fallthrough
CT: control target
= control target key end

     0   :  { %10 = vsyncpa [#allocation3], 0  ;;  %s1129_s0 = inlined_call_operand.hbm [shape: bf16[16,128], index: 0, kind: input, shape index: {}]   ;;  %s1130_s1 = inlined_call_operand.hbm [shape: f32[16,1], index: 1, kind: input, shape index: {}]   ;;  %s1131_s2 = inlined_call_operand.hbm [shape: f32[16,1], index: 2, kind: input, shape index: {}]   ;;  %s1132_s3 = inlined_call_operand.hbm [shape: bf16[3,128,256], index: 3, kind: input, shape index: {}]   ;;  %s1133_s4 = inlined_call_operand.hbm [shape: f32[3,1,256], index: 4, kind: input, shape index: {}]   ;;  %s1134_s5 = inlined_call_operand.hbm [shape: f32[16,128], index: 5, kind: output, shape index: {}]  }
   0x1   :  { %11 = vsyncpa [#allocation6], 0 }
   0x2   :  { %12 = vsyncpa [#allocation9], 0 }
   0x3   :  { %13 = vsyncpa [#allocation4], 0  ;;  %s972_s18 = smov [#allocation5]   ;;  %s832_s22 = scalar_lea.hbm %s1130_s1, 256 }
   0x4   :  { %s31_s19 = sshll.u32 %s972_s18, 4  ;;  %p833_p0 = scmp.ne.s32.totalorder %s1130_s1, %s832_s22  ;;  %s32_s19 = int_to_ptr.vmem [resolvable:$true] %s31_s19 }
   0x5   :  { %p836_p1 = scmp.lt.u32.totalorder %s832_s22, %s1130_s1 }
   0x7   :  { %p838_p2 = pnand %p836_p1, %p833_p0 }
   0x9   :  { %841 = shalt.err (!%p838_p2)
}
   0xa   :  { %s842_s27 = scalar_lea.vmem %s32_s19, 256  ;;  %p847_p4 = scmp.lt.s32.totalorder %s32_s19, %s32_s19 }
   0xb   :  { %p843_p3 = scmp.ne.s32.totalorder %s32_s19, %s842_s27  ;;  %p848_p5 = scmp.lt.s32.totalorder %s842_s27, %s842_s27 }
   0xd   :  { %p849_p6 = por %p848_p5, %p847_p4 }
   0xf   :  { %p850_p7 = pnand %p849_p6, %p843_p3 }
  0x11   :  { %853 = shalt.err (!%p850_p7)
}
  0x12   :  { %s973_s28 = smov 128   ;;  %s974_s29 = smov 8  }
  0x13   :  { %37 = dma.hbm_to_vmem [thread:$0]  %s1130_s1, 256, %s32_s19, [#allocation6], %s973_s28, %s973_s28, %s974_s29  }
  0x14   :  { %s975_s7 = smov [#allocation8]   ;;  %s976_s9 = smov [#allocation2]  }
  0x15   :  { %s55_s8 = sshll.u32 %s975_s7, 4  ;;  %s19_s10 = sshll.u32 %s976_s9, 4  ;;  %s56_s8 = int_to_ptr.vmem [resolvable:$true] %s55_s8  ;;  %s20_s10 = int_to_ptr.vmem [resolvable:$true] %s19_s10 }
  0x16   :  { %s854_s13 = scalar_lea.hbm %s1132_s3, 6144 }
  0x17   :  { %p855_p8 = scmp.ne.s32.totalorder %s1132_s3, %s854_s13  ;;  %p858_p9 = scmp.lt.u32.totalorder %s854_s13, %s1132_s3 }
  0x19   :  { %p860_p10 = pnand %p858_p9, %p855_p8 }
  0x1b   :  { %863 = shalt.err (!%p860_p10)
}
  0x1c   :  { %s864_s1 = scalar_lea.vmem %s56_s8, 6144  ;;  %p869_p12 = scmp.lt.s32.totalorder %s56_s8, %s56_s8 }
  0x1d   :  { %p865_p11 = scmp.ne.s32.totalorder %s56_s8, %s864_s1  ;;  %p870_p13 = scmp.lt.s32.totalorder %s864_s1, %s864_s1 }
  0x1f   :  { %p871_p0 = por %p870_p13, %p869_p12 }
  0x21   :  { %p872_p1 = pnand %p871_p0, %p865_p11 }
  0x23   :  { %875 = shalt.err (!%p872_p1)
}
  0x24   :  { %61 = dma.hbm_to_vmem [thread:$0]  %s1132_s3, 6144, %s56_s8, [#allocation9], %s973_s28, %s973_s28, %s974_s29  }
  0x25   :  { %s876_s22 = scalar_lea.hbm %s1129_s0, 128 }
  0x26   :  { %p877_p2 = scmp.ne.s32.totalorder %s1129_s0, %s876_s22  ;;  %p880_p3 = scmp.lt.u32.totalorder %s876_s22, %s1129_s0 }
  0x28   :  { %p882_p4 = pnand %p880_p3, %p877_p2 }
  0x2a   :  { %885 = shalt.err (!%p882_p4)
}
  0x2b   :  { %s886_s27 = scalar_lea.vmem %s20_s10, 128  ;;  %p891_p6 = scmp.lt.s32.totalorder %s20_s10, %s20_s10 }
  0x2c   :  { %p887_p5 = scmp.ne.s32.totalorder %s20_s10, %s886_s27  ;;  %p892_p7 = scmp.lt.s32.totalorder %s886_s27, %s886_s27 }
  0x2e   :  { %p893_p8 = por %p892_p7, %p891_p6 }
  0x30   :  { %p894_p9 = pnand %p893_p8, %p887_p5 }
  0x32   :  { %897 = shalt.err (!%p894_p9)
}
  0x33   :  { %s977_s3 = smov 64   ;;  %s978_s30 = smov 4  }
  0x34   :  { %25 = dma.hbm_to_vmem [thread:$0]  %s1129_s0, 128, %s20_s10, [#allocation3], %s977_s3, %s977_s3, %s978_s30  }
  0x35   :  { %s979_s8 = smov [#allocation7]   ;;  %s980_s11 = smov [#allocation10]  }
  0x36   :  { %s43_s9 = sshll.u32 %s979_s8, 4  ;;  %s67_s12 = sshll.u32 %s980_s11, 4  ;;  %s44_s9 = int_to_ptr.vmem [resolvable:$true] %s43_s9  ;;  %s68_s12 = int_to_ptr.vmem [resolvable:$true] %s67_s12 }
  0x37   :  { %s898_s15 = scalar_lea.hbm %s1131_s2, 256 }
  0x38   :  { %p899_p10 = scmp.ne.s32.totalorder %s1131_s2, %s898_s15  ;;  %p902_p11 = scmp.lt.u32.totalorder %s898_s15, %s1131_s2 }
  0x3a   :  { %p904_p12 = pnand %p902_p11, %p899_p10 }
  0x3c   :  { %907 = shalt.err (!%p904_p12)
}
  0x3d   :  { %s908_s0 = scalar_lea.vmem %s44_s9, 256  ;;  %p913_p0 = scmp.lt.s32.totalorder %s44_s9, %s44_s9 }
  0x3e   :  { %p909_p13 = scmp.ne.s32.totalorder %s44_s9, %s908_s0  ;;  %p914_p1 = scmp.lt.s32.totalorder %s908_s0, %s908_s0 }
  0x40   :  { %p915_p2 = por %p914_p1, %p913_p0 }
  0x42   :  { %p916_p3 = pnand %p915_p2, %p909_p13 }
  0x44   :  { %919 = shalt.err (!%p916_p3)
}
  0x45   :  { %49 = dma.hbm_to_vmem [thread:$0]  %s1131_s2, 256, %s44_s9, [#allocation6], %s973_s28, %s973_s28, %s974_s29  }
  0x46   :  { %s920_s22 = scalar_lea.hbm %s1133_s4, 96 }
  0x47   :  { %p921_p4 = scmp.ne.s32.totalorder %s1133_s4, %s920_s22  ;;  %p924_p5 = scmp.lt.u32.totalorder %s920_s22, %s1133_s4 }
  0x49   :  { %p926_p6 = pnand %p924_p5, %p921_p4 }
  0x4b   :  { %929 = shalt.err (!%p926_p6)
}
  0x4c   :  { %s930_s27 = scalar_lea.vmem %s68_s12, 96  ;;  %p935_p8 = scmp.lt.s32.totalorder %s68_s12, %s68_s12 }
  0x4d   :  { %p931_p7 = scmp.ne.s32.totalorder %s68_s12, %s930_s27  ;;  %p936_p9 = scmp.lt.s32.totalorder %s930_s27, %s930_s27 }
  0x4f   :  { %p937_p10 = por %p936_p9, %p935_p8 }
  0x51   :  { %p938_p11 = pnand %p937_p10, %p931_p7 }
  0x53   :  { %941 = shalt.err (!%p938_p11)
}
  0x54   :  { %s981_s2 = smov 32   ;;  %s982_s3 = smov 2  }
  0x55   :  { %73 = dma.hbm_to_vmem [thread:$0]  %s1133_s4, 96, %s68_s12, [#allocation9], %s981_s2, %s981_s2, %s982_s3  }
  0x56   :  { %964 = dma.done.wait [#allocation3], 128  }
  0x57   :  { %965 = vsyncadd [#allocation3], 4294967168 }
  0x58   :  { %966 = dma.done.wait [#allocation6], 512  }
  0x59   :  { %967 = vsyncadd [#allocation6], 4294966784 }
  0x5a   :  { %968 = dma.done.wait [#allocation9], 6240  }
  0x5b   :  { %969 = vsyncadd [#allocation9], 4294961056  ;;  %v983_v0 = vmov 0   ;;  %v108_v1 = vld [vmem:[#allocation7] sm:$0xff]  ;;  %v94_v2 = vld [vmem:[#allocation5] sm:$0xff]  ;;  %v141_v49 = vlaneseq  ;;  %s984_s4 = smov [#allocation11]  }
  0x5c   :  { %735 = vset.pattern.permute.xlu1 %v983_v0  ;;  %734 = vset.pattern.permute.xlu0 %v983_v0  ;;  %v109_v3 = vld [vmem:[#allocation7 + $0x8] sm:$0xff]  ;;  %v95_v4 = vld [vmem:[#allocation5 + $0x8] sm:$0xff]  ;;  %v139_v52 = vld [vmem:[#allocation10] sm:$0x3]  ;;  %s649_s7 = sshll.u32 %s984_s4, 4  ;;  %s650_s7 = int_to_ptr.vmem [resolvable:$true] %s649_s7 }
  0x5d   :  { %263 = vmatprep.mubr.bf16.mxu0 %v983_v0  ;;  %437 = vmatprep.mubr.bf16.mxu1 %v983_v0  ;;  %v736_v5 = vld [vmem:[#allocation8 + $0x4] ss:$8 sps:$4 sm:$0xff]   ;;  %v738_v6 = vld [vmem:[#allocation8] ss:$8 sps:$4 sm:$0xff]   ;;  %v739_v7 = vld [vmem:[#allocation8 + $0x14] ss:$8 sps:$4 sm:$0xff]   ;;  %p947_p13 = scmp.lt.s32.totalorder %s650_s7, %s650_s7 }
  0x5e   :  { %112 = vperm.xlu1 %735, %v108_v1   ;;  %98 = vperm.xlu0 %734, %v94_v2   ;;  %v741_v8 = vld [vmem:[#allocation8 + $0x10] ss:$8 sps:$4 sm:$0xff]   ;;  %v742_v9 = vld [vmem:[#allocation8 + $0x24] ss:$8 sps:$4 sm:$0xff]   ;;  %v744_v10 = vld [vmem:[#allocation8 + $0x20] ss:$8 sps:$4 sm:$0xff]  }
  0x5f   :  { %231 = vmatprep.subr.bf16.mxu0 %v736_v5  ;;  %v745_v11 = vld [vmem:[#allocation8 + $0x34] ss:$8 sps:$4 sm:$0xff]   ;;  %v747_v12 = vld [vmem:[#allocation8 + $0x30] ss:$8 sps:$4 sm:$0xff]   ;;  %v748_v13 = vld [vmem:[#allocation8 + $0x44] ss:$8 sps:$4 sm:$0xff]  }
  0x60   :  { %232 = vmatpush1.bf16.msra.mxu0 %v738_v6  ;;  %v750_v14 = vld [vmem:[#allocation8 + $0x40] ss:$8 sps:$4 sm:$0xff]   ;;  %v751_v15 = vld [vmem:[#allocation8 + $0x54] ss:$8 sps:$4 sm:$0xff]   ;;  %v753_v16 = vld [vmem:[#allocation8 + $0x50] ss:$8 sps:$4 sm:$0xff]  }
  0x61   :  { %233 = vmatprep.subr.bf16.mxu0 %v739_v7  ;;  %v754_v17 = vld [vmem:[#allocation8 + $0x64] ss:$8 sps:$4 sm:$0xff]   ;;  %v756_v18 = vld [vmem:[#allocation8 + $0x60] ss:$8 sps:$4 sm:$0xff]   ;;  %v757_v19 = vld [vmem:[#allocation8 + $0x74] ss:$8 sps:$4 sm:$0xff]  }
  0x62   :  { %117 = vperm.xlu1 %735, %v109_v3   ;;  %103 = vperm.xlu0 %734, %v95_v4   ;;  %v759_v20 = vld [vmem:[#allocation8 + $0x70] ss:$8 sps:$4 sm:$0xff]   ;;  %v760_v33 = vld [vmem:[#allocation8 + $0x84] ss:$8 sps:$4 sm:$0xff]   ;;  %v762_v34 = vld [vmem:[#allocation8 + $0x80] ss:$8 sps:$4 sm:$0xff]  }
  0x63   :  { %v718_v21 = vld [vmem:[#allocation2] sm:$0xff]   ;;  %405 = vmatprep.subr.bf16.mxu1 %v760_v33  ;;  %v766_v37 = vld [vmem:[#allocation8 + $0xa4] ss:$8 sps:$4 sm:$0xff]   ;;  %v768_v38 = vld [vmem:[#allocation8 + $0xa0] ss:$8 sps:$4 sm:$0xff]   ;;  %v142_v50 = vshrl.u32 %v141_v49, 7 }
  0x64   :  { %234 = vmatpush1.bf16.msra.mxu0 %v741_v8  ;;  %v719_v22 = vunpack.c.l.bf16 %v718_v21  ;;  %v720_v25 = vunpack.c.h.bf16 %v718_v21  ;;  %406 = vmatpush1.bf16.msra.mxu1 %v762_v34  ;;  %v763_v35 = vld [vmem:[#allocation8 + $0x94] ss:$8 sps:$4 sm:$0xff]   ;;  %v765_v36 = vld [vmem:[#allocation8 + $0x90] ss:$8 sps:$4 sm:$0xff]   ;;  %v772_v41 = vld [vmem:[#allocation8 + $0xc4] ss:$8 sps:$4 sm:$0xff]  }
  0x65   :  { %235 = vmatprep.subr.bf16.mxu0 %v742_v9  ;;  %407 = vmatprep.subr.bf16.mxu1 %v763_v35  ;;  %v769_v39 = vld [vmem:[#allocation8 + $0xb4] ss:$8 sps:$4 sm:$0xff]   ;;  %v771_v40 = vld [vmem:[#allocation8 + $0xb0] ss:$8 sps:$4 sm:$0xff]   ;;  %v774_v42 = vld [vmem:[#allocation8 + $0xc0] ss:$8 sps:$4 sm:$0xff]  }
  0x66   :  { %v775_v43 = vld [vmem:[#allocation8 + $0xd4] ss:$8 sps:$4 sm:$0xff]   ;;  %v777_v44 = vld [vmem:[#allocation8 + $0xd0] ss:$8 sps:$4 sm:$0xff]   ;;  %v778_v45 = vld [vmem:[#allocation8 + $0xe4] ss:$8 sps:$4 sm:$0xff]  }
  0x67   :  { %v780_v46 = vld [vmem:[#allocation8 + $0xe0] ss:$8 sps:$4 sm:$0xff]   ;;  %v781_v47 = vld [vmem:[#allocation8 + $0xf4] ss:$8 sps:$4 sm:$0xff]   ;;  %v783_v48 = vld [vmem:[#allocation8 + $0xf0] ss:$8 sps:$4 sm:$0xff]  }
  0x68   :  { %236 = vmatpush1.bf16.msra.mxu0 %v744_v10  ;;  %408 = vmatpush1.bf16.msra.mxu1 %v765_v36  ;;  %v1090_v51 = vsub.s32 0, %v142_v50  ;;  %v1093_v62 = vsub.s32 1, %v142_v50  ;;  %v792_v21 = vld [vmem:[#allocation8 + $0x124] ss:$8 sps:$4 sm:$0xff]   ;;  %v313_v33 = vld [vmem:[#allocation10 + $0x2] sm:$0x3] }
  0x69   :  { %237 = vmatprep.subr.bf16.mxu0 %v745_v11  ;;  %409 = vmatprep.subr.bf16.mxu1 %v766_v37  ;;  %s942_s8 = scalar_lea.vmem %s650_s7, 256 }
  0x6a   :  { %v144_v53 = vrot.slane %v139_v52, %v1090_v51  ;;  %v318_v34 = vrot.slane %v313_v33, %v1090_v51  ;;  %p943_p12 = scmp.ne.s32.totalorder %s650_s7, %s942_s8  ;;  %p948_p0 = scmp.lt.s32.totalorder %s942_s8, %s942_s8 }
  0x6c   :  { %238 = vmatpush1.bf16.msra.mxu0 %v747_v12  ;;  %410 = vmatpush1.bf16.msra.mxu1 %v768_v38  ;;  %p949_p1 = por %p948_p0, %p947_p13 }
  0x6d   :  { %239 = vmatprep.subr.bf16.mxu0 %v748_v13  ;;  %411 = vmatprep.subr.bf16.mxu1 %v769_v39 }
  0x6e   :  { %p950_p2 = pnand %p949_p1, %p943_p12 }
  0x70   :  { %240 = vmatpush1.bf16.msra.mxu0 %v750_v14  ;;  %412 = vmatpush1.bf16.msra.mxu1 %v771_v40 }
  0x71   :  { %241 = vmatprep.subr.bf16.mxu0 %v751_v15  ;;  %413 = vmatprep.subr.bf16.mxu1 %v772_v41 }
  0x74   :  { %242 = vmatpush1.bf16.msra.mxu0 %v753_v16  ;;  %414 = vmatpush1.bf16.msra.mxu1 %v774_v42 }
  0x75   :  { %243 = vmatprep.subr.bf16.mxu0 %v754_v17  ;;  %415 = vmatprep.subr.bf16.mxu1 %v775_v43  ;;  %v786_v17 = vld [vmem:[#allocation8 + $0x104] ss:$8 sps:$4 sm:$0xff]  }
  0x78   :  { %244 = vmatpush1.bf16.msra.mxu0 %v756_v18  ;;  %416 = vmatpush1.bf16.msra.mxu1 %v777_v44  ;;  %v784_v18 = vld [vmem:[#allocation8 + $0x100] ss:$8 sps:$4 sm:$0xff]   ;;  %v322_v44 = vrot.slane %v313_v33, %v1093_v62 }
  0x79   :  { %245 = vmatprep.subr.bf16.mxu0 %v757_v19  ;;  %417 = vmatprep.subr.bf16.mxu1 %v778_v45  ;;  %v789_v19 = vld [vmem:[#allocation8 + $0x114] ss:$8 sps:$4 sm:$0xff]  }
  0x7c   :  { %246 = vmatpush1.bf16.msra.mxu0 %v759_v20  ;;  %418 = vmatpush1.bf16.msra.mxu1 %v780_v46  ;;  %v787_v20 = vld [vmem:[#allocation8 + $0x110] ss:$8 sps:$4 sm:$0xff]  }
  0x7d   :  { %419 = vmatprep.subr.bf16.mxu1 %v781_v47  ;;  %579 = vmatprep.subr.bf16.mxu0 %v786_v17 }
  0x80   :  { %420 = vmatpush1.bf16.msra.mxu1 %v783_v48 }
  0xdd   :  { %v113_v23 = vpop.permute.xlu1 %112  ;;  %v99_v24 = vpop.permute.xlu0 %98 }
  0xde   :  { %v106_v26 = vmul.f32 %v719_v22, %v99_v24  ;;  %v790_v22 = vld [vmem:[#allocation8 + $0x120] ss:$8 sps:$4 sm:$0xff]   ;;  %v793_v24 = vld [vmem:[#allocation8 + $0x130] ss:$8 sps:$4 sm:$0xff]  }
  0xe0   :  { %v1084_v30 = vadd.f32 %v113_v23, %v106_v26  ;;  %v795_v23 = vld [vmem:[#allocation8 + $0x134] ss:$8 sps:$4 sm:$0xff]   ;;  %v796_v26 = vld [vmem:[#allocation8 + $0x140] ss:$8 sps:$4 sm:$0xff]  }
  0xe1   :  { %v104_v27 = vpop.permute.xlu0 %103  ;;  %v118_v29 = vpop.permute.xlu1 %117 }
  0xe2   :  { %v107_v28 = vmul.f32 %v720_v25, %v104_v27  ;;  %v798_v25 = vld [vmem:[#allocation8 + $0x144] ss:$8 sps:$4 sm:$0xff]   ;;  %v801_v27 = vld [vmem:[#allocation8 + $0x154] ss:$8 sps:$4 sm:$0xff]  }
  0xe4   :  { %v1086_v31 = vadd.f32 %v118_v29, %v107_v28  ;;  %v799_v28 = vld [vmem:[#allocation8 + $0x150] ss:$8 sps:$4 sm:$0xff]   ;;  %v804_v29 = vld [vmem:[#allocation8 + $0x164] ss:$8 sps:$4 sm:$0xff]  }
  0xe6   :  { %v122_v32 = vpack.c.bf16 %v1086_v31, %v1084_v30 }
  0xe8   :  { %264 = vmatmul.mubr.bf16.vlgmr.msra.gmra.mrb[0].mxu0 %v122_v32  ;;  %v805_v32 = vld [vmem:[#allocation8 + $0x170] ss:$8 sps:$4 sm:$0xff]  }
  0xe9   :  { %611 = vmatprep.mubr.bf16.mxu0 %v983_v0  ;;  %v148_v0 = vrot.slane %v139_v52, %v1093_v62  ;;  %580 = vmatpush1.bf16.msra.mxu0 %v784_v18 }
  0xea   :  { %581 = vmatprep.subr.bf16.mxu0 %v789_v19 }
  0xed   :  { %582 = vmatpush1.bf16.msra.mxu0 %v787_v20 }
  0xee   :  { %583 = vmatprep.subr.bf16.mxu0 %v792_v21 }
  0xf1   :  { %584 = vmatpush1.bf16.msra.mxu0 %v790_v22 }
  0xf2   :  { %585 = vmatprep.subr.bf16.mxu0 %v795_v23 }
  0xf5   :  { %586 = vmatpush1.bf16.msra.mxu0 %v793_v24 }
  0xf6   :  { %587 = vmatprep.subr.bf16.mxu0 %v798_v25 }
  0xf9   :  { %588 = vmatpush1.bf16.msra.mxu0 %v796_v26 }
  0xfa   :  { %589 = vmatprep.subr.bf16.mxu0 %v801_v27 }
  0xfd   :  { %590 = vmatpush1.bf16.msra.mxu0 %v799_v28 }
  0xfe   :  { %591 = vmatprep.subr.bf16.mxu0 %v804_v29 }
 0x1bb   :  { %v265_v54 = vpop.f32.mrb[0].mxu0 }
 0x1bc   :  { %v266_v55 = vadd.f32 %v265_v54, %v144_v53  ;;  %v267_v56 = vpop.f32.mrb[1].mxu0 }
 0x1bd   :  { %v269_v57 = vpop.f32.mrb[2].mxu0  ;;  %v268_v4 = vadd.f32 %v267_v56, %v148_v0 }
 0x1be   :  { %v679_v58 = vmul.f32 -1.442695, %v266_v55  ;;  %v270_v59 = vadd.f32 %v269_v57, %v144_v53  ;;  %v271_v60 = vpop.f32.mrb[3].mxu0 }
 0x1bf   :  { %v272_v5 = vadd.f32 %v271_v60, %v148_v0  ;;  %v286_v6 = vmax.f32 %v268_v4, 0.0 }
 0x1c0   :  { %808 = vpow2.f32 %v679_v58  ;;  %v680_v61 = vmul.f32 -1.442695, %v270_v59 }
 0x1c1   :  { %v287_v7 = vmax.f32 %v272_v5, 0.0  ;;  %v288_v8 = vsub.f32 %v286_v6, %v1084_v30 }
 0x1c2   :  { %810 = vpow2.f32 %v680_v61 }
 0x1c3   :  { %v289_v11 = vsub.f32 %v287_v7, %v1086_v31 }
 0x1ca   :  { %v809_v63 = vpop.eup %808 }
 0x1cb   :  { %v280_v1 = vadd.f32 1.0, %v809_v63  ;;  %v487_v63 = vld [vmem:[#allocation10 + $0x4] sm:$0x3] }
 0x1cc   :  { %v811_v2 = vpop.eup %810  ;;  %v492_v0 = vrot.slane %v487_v63, %v1090_v51 }
 0x1cd   :  { %812 = vrcp.f32 %v280_v1  ;;  %v281_v3 = vadd.f32 1.0, %v811_v2 }
 0x1cf   :  { %814 = vrcp.f32 %v281_v3 }
 0x1d7   :  { %v813_v9 = vpop.eup %812 }
 0x1d8   :  { %v290_v10 = vmul.f32 %v813_v9, %v288_v8 }
 0x1d9   :  { %v815_v12 = vpop.eup %814 }
 0x1da   :  { %v291_v13 = vmul.f32 %v815_v12, %v289_v11  ;;  %v1099_v14 = vadd.f32 %v290_v10, %v1084_v30  ;;  %v802_v30 = vld [vmem:[#allocation8 + $0x160] ss:$8 sps:$4 sm:$0xff]   ;;  %v496_v10 = vrot.slane %v487_v63, %v1093_v62 }
 0x1db   :  { %592 = vmatpush1.bf16.msra.mxu0 %v802_v30 }
 0x1dc   :  { %v1102_v15 = vadd.f32 %v291_v13, %v1086_v31  ;;  %v807_v31 = vld [vmem:[#allocation8 + $0x174] ss:$8 sps:$4 sm:$0xff]  }
 0x1dd   :  { %593 = vmatprep.subr.bf16.mxu0 %v807_v31 }
 0x1de   :  { %v294_v16 = vpack.c.bf16 %v1102_v15, %v1099_v14 }
 0x1df   :  { %594 = vmatpush1.bf16.msra.mxu0 %v805_v32 }
 0x1e0   :  { %438 = vmatmul.mubr.bf16.vlgmr.msra.gmra.mrb[0].mxu1 %v294_v16 }
 0x2b3   :  { %v439_v35 = vpop.f32.mrb[0].mxu1 }
 0x2b4   :  { %v440_v36 = vadd.f32 %v439_v35, %v318_v34  ;;  %v441_v37 = vpop.f32.mrb[1].mxu1 }
 0x2b5   :  { %v443_v38 = vpop.f32.mrb[2].mxu1  ;;  %v442_v48 = vadd.f32 %v441_v37, %v322_v44 }
 0x2b6   :  { %v697_v39 = vmul.f32 -1.442695, %v440_v36  ;;  %v444_v40 = vadd.f32 %v443_v38, %v318_v34  ;;  %v445_v41 = vpop.f32.mrb[3].mxu1 }
 0x2b7   :  { %v446_v49 = vadd.f32 %v445_v41, %v322_v44  ;;  %v460_v50 = vmax.f32 %v442_v48, 0.0 }
 0x2b8   :  { %816 = vpow2.f32 %v697_v39  ;;  %v698_v42 = vmul.f32 -1.442695, %v444_v40 }
 0x2b9   :  { %v461_v52 = vmax.f32 %v446_v49, 0.0  ;;  %v462_v53 = vsub.f32 %v460_v50, %v1099_v14 }
 0x2ba   :  { %818 = vpow2.f32 %v698_v42 }
 0x2bb   :  { %v463_v56 = vsub.f32 %v461_v52, %v1102_v15 }
 0x2c2   :  { %v817_v43 = vpop.eup %816 }
 0x2c3   :  { %v454_v45 = vadd.f32 1.0, %v817_v43 }
 0x2c4   :  { %v819_v46 = vpop.eup %818 }
 0x2c5   :  { %820 = vrcp.f32 %v454_v45  ;;  %v455_v47 = vadd.f32 1.0, %v819_v46 }
 0x2c7   :  { %822 = vrcp.f32 %v455_v47 }
 0x2cf   :  { %v821_v54 = vpop.eup %820 }
 0x2d0   :  { %v464_v55 = vmul.f32 %v821_v54, %v462_v53 }
 0x2d1   :  { %v823_v57 = vpop.eup %822 }
 0x2d2   :  { %v465_v58 = vmul.f32 %v823_v57, %v463_v56  ;;  %v466_v59 = vadd.f32 %v464_v55, %v1099_v14 }
 0x2d4   :  { %v467_v60 = vadd.f32 %v465_v58, %v1102_v15 }
 0x2d6   :  { %v468_v61 = vpack.c.bf16 %v467_v60, %v466_v59 }
 0x2d8   :  { %612 = vmatmul.mubr.bf16.vlgmr.msra.gmra.mrb[4].mxu0 %v468_v61 }
 0x3ab   :  { %v613_v1 = vpop.f32.mrb[4].mxu0 }
 0x3ac   :  { %v614_v2 = vadd.f32 %v613_v1, %v492_v0  ;;  %v615_v3 = vpop.f32.mrb[5].mxu0 }
 0x3ad   :  { %v617_v4 = vpop.f32.mrb[6].mxu0  ;;  %v616_v14 = vadd.f32 %v615_v3, %v496_v10 }
 0x3ae   :  { %v715_v5 = vmul.f32 -1.442695, %v614_v2  ;;  %v618_v6 = vadd.f32 %v617_v4, %v492_v0  ;;  %v619_v7 = vpop.f32.mrb[7].mxu0 }
 0x3af   :  { %v620_v51 = vadd.f32 %v619_v7, %v496_v10  ;;  %v634_v15 = vmax.f32 %v616_v14, 0.0 }
 0x3b0   :  { %824 = vpow2.f32 %v715_v5  ;;  %v716_v8 = vmul.f32 -1.442695, %v618_v6 }
 0x3b1   :  { %v635_v16 = vmax.f32 %v620_v51, 0.0  ;;  %v636_v17 = vsub.f32 %v634_v15, %v466_v59 }
 0x3b2   :  { %826 = vpow2.f32 %v716_v8 }
 0x3b3   :  { %v637_v20 = vsub.f32 %v635_v16, %v467_v60 }
 0x3ba   :  { %v825_v9 = vpop.eup %824 }
 0x3bb   :  { %v628_v11 = vadd.f32 1.0, %v825_v9 }
 0x3bc   :  { %v827_v12 = vpop.eup %826 }
 0x3bd   :  { %828 = vrcp.f32 %v628_v11  ;;  %v629_v13 = vadd.f32 1.0, %v827_v12 }
 0x3bf   :  { %830 = vrcp.f32 %v629_v13 }
 0x3c7   :  { %v829_v18 = vpop.eup %828 }
 0x3c8   :  { %v638_v19 = vmul.f32 %v829_v18, %v636_v17 }
 0x3c9   :  { %v831_v21 = vpop.eup %830 }
 0x3ca   :  { %v639_v22 = vmul.f32 %v831_v21, %v637_v20  ;;  %v640_v23 = vadd.f32 %v638_v19, %v466_v59 }
 0x3cc   :  { %v641_v24 = vadd.f32 %v639_v22, %v467_v60  ;;  %642 = vst [vmem:[#allocation11] sm:$0xff] %v640_v23 }
 0x3ce   :  { %643 = vst [vmem:[#allocation11 + $0x8] sm:$0xff] %v641_v24 }
 0x3cf   :  { %953 = shalt.err (!%p950_p2)
}
 0x3d0   :  { %s954_s12 = scalar_lea.hbm %s1134_s5, 256 }
 0x3d1   :  { %p955_p3 = scmp.ne.s32.totalorder %s1134_s5, %s954_s12  ;;  %p958_p4 = scmp.lt.u32.totalorder %s954_s12, %s1134_s5 }
 0x3d3   :  { %p960_p5 = pnand %p958_p4, %p955_p3 }
 0x3d5   :  { %963 = shalt.err (!%p960_p5)
}
 0x3d6   :  { %655 = dma.vmem_to_hbm [thread:$0]  %s650_s7, 256, %s1134_s5, [#allocation4], %s973_s28, %s973_s28, %s974_s29  }
 0x3d7   :  { %970 = dma.done.wait [#allocation4], 256  }
 0x3d8   :  { %971 = vsyncadd [#allocation4], 4294967040 }
 0x3d9   :  { %659 = vsyncpa [#allocation3], 1 }
 0x3da   :  { %660 = vsyncpa [#allocation6], 1 }
 0x3db   :  { %661 = vsyncpa [#allocation9], 1 }
 0x3dc   :  { %662 = vsyncpa [#allocation4], 1 }

</bundles_post_ra>
